<compile_context>
chip_gen: v7x
topology: tpu7x:2x2x1
jax: 0.10.0
libtpu: 0.0.40
codegen_flags: <defaults>
</compile_context>

<pallas_src>
import math
from functools import partial

import jax
import jax.numpy as jnp
from jax.experimental import pallas as pl
from jax.experimental.pallas import tpu as pltpu


# ----------------------------------------------------------------------------
# Pallas kernel 1: fused 3x3 / stride-2 conv  (in-VMEM im2col + MXU matmul
#                  + bias + ReLU), lane-dense 128-channel NHWC output.
# ----------------------------------------------------------------------------
def _conv3x3s2_kernel(xp_ref, w_ref, b_ref, o_ref, patch_ref, *, ho, wo, cin, relu):
    # xp_ref:    (4, Ho+1, Wo+1, Cin) bf16 -- parity planes of the padded input
    # w_ref:     (9*Cin, CoutP)       bf16
    # b_ref:     (1, CoutP)           f32
    # o_ref:     (1, Ho*Wo, CoutP)    f32
    # patch_ref: (Ho*Wo, 9*Cin)       bf16 VMEM scratch (in-kernel im2col buffer)
    #
    # Patch assembly: fully static (trace-time unrolled) copies from the parity
    # planes into the im2col scratch.  All offsets are Python ints, so Mosaic
    # sees constant, aligned slices.
    for di in range(3):
        for dj in range(3):
            t = di * 3 + dj
            plane = (di % 2) * 2 + (dj % 2)
            pr, pc = di // 2, dj // 2
            for oh in range(ho):
                patch_ref[pl.ds(oh * wo, wo), pl.ds(t * cin, cin)] = (
                    xp_ref[plane, pr + oh, pl.ds(pc, wo), :])

    w = w_ref[...]                               # (K, CoutP) bf16, loaded once
    b = b_ref[...]                               # (1, CoutP) f32,  loaded once
    acc = jnp.dot(patch_ref[...], w, preferred_element_type=jnp.float32)
    acc = acc + b                                # sublane-broadcast bias
    if relu:
        acc = jnp.maximum(acc, 0.0)
    o_ref[0] = acc.astype(o_ref.dtype)


def _phase_split(x_nhwc):
    """Zero-pad by 1 and split into 4 stride-2 parity planes (plane = (h%2)*2+(w%2)).

    (B, H, W, C) f32 -> (B*4, H//2+1, W//2+1, C) bf16.  Only ~1x HBM traffic,
    unlike a 9x im2col materialization."""
    B, H, W, C = x_nhwc.shape
    xp = jnp.pad(x_nhwc, ((0, 0), (1, 1), (1, 1), (0, 0)))
    planes = jnp.stack(
        [xp[:, ph::2, pw::2, :] for ph in (0, 1) for pw in (0, 1)], axis=1)
    return planes.reshape(B * 4, H // 2 + 1, W // 2 + 1, C).astype(jnp.bfloat16)


def conv3x3_s2_pallas(x_nhwc, w_flat, bias_row, *, relu=True):
    """3x3 conv, stride 2, pad 1.  x_nhwc: (B,H,W,Cin); w_flat: (9*Cin, CoutP)
    bf16; bias_row: (1, CoutP) f32.  Returns (B, H/2, W/2, CoutP) f32 NHWC."""
    B, H, W, Cin = x_nhwc.shape
    assert H % 2 == 0 and W % 2 == 0
    Ho, Wo = H // 2, W // 2
    M = Ho * Wo
    K, CoutP = w_flat.shape
    assert K == 9 * Cin
    xph = _phase_split(x_nhwc)                              # (B*4, Ho+1, Wo+1, Cin)

    cost = pl.CostEstimate(
        flops=2 * B * M * K * CoutP,
        transcendentals=0,
        bytes_accessed=(xph.size * 2 + w_flat.size * 2 + bias_row.size * 4
                        + B * M * CoutP * 4))

    out = pl.pallas_call(
        partial(_conv3x3s2_kernel, ho=Ho, wo=Wo, cin=Cin, relu=relu),
        out_shape=jax.ShapeDtypeStruct((B, M, CoutP), jnp.float32),
        grid_spec=pltpu.PrefetchScalarGridSpec(
            num_scalar_prefetch=0,
            grid=(B,),
            in_specs=[
                pl.BlockSpec((4, Ho + 1, Wo + 1, Cin), lambda b: (b, 0, 0, 0)),
                pl.BlockSpec((K, CoutP), lambda b: (0, 0)),   # grid-invariant
                pl.BlockSpec((1, CoutP), lambda b: (0, 0)),   # grid-invariant
            ],
            out_specs=pl.BlockSpec((1, M, CoutP), lambda b: (b, 0, 0)),
            scratch_shapes=[pltpu.VMEM((M, K), jnp.bfloat16)],
        ),
        compiler_params=pltpu.CompilerParams(
            dimension_semantics=("parallel",),
            vmem_limit_bytes=32 * 1024 * 1024),
        cost_estimate=cost,
    )(xph, w_flat, bias_row)
    return out.reshape(B, Ho, Wo, CoutP)


def _prep_conv_params(w_pt, b_pt, cin_pad, cout_pad):
    """PyTorch (Cout, Cin, 3, 3) weight -> (9*cin_pad, cout_pad) bf16 (row index
    = (di*3+dj)*cin_pad + ci), bias -> (1, cout_pad) f32 (zero padded)."""
    cout, cin, kh, kw = w_pt.shape
    w = jnp.transpose(w_pt, (2, 3, 1, 0))                   # (kh, kw, Cin, Cout)
    w = jnp.pad(w, ((0, 0), (0, 0), (0, cin_pad - cin), (0, cout_pad - cout)))
    w = w.reshape(kh * kw * cin_pad, cout_pad).astype(jnp.bfloat16)
    b = jnp.pad(b_pt, (0, cout_pad - cout)).reshape(1, cout_pad).astype(jnp.float32)
    return w, b


# ----------------------------------------------------------------------------
# Pallas kernel 2: PositionEmbeddingSine (DETR semantics), NCHW output with the
#                  spatial axis flattened onto lanes; one sin per element
#                  (phase shift replaces the sin/cos interleave select).
# ----------------------------------------------------------------------------
def _pos_sine_kernel(yx_ref, idt_ref, ph_ref, pos_ref):
    # yx_ref:  (1, 2, S)       f32 -- [0]=normalized y_embed, [1]=x_embed
    # idt_ref: (npf, 1)        f32 -- 1 / dim_t
    # ph_ref:  (npf, 1)        f32 -- (k % 2) * pi/2
    # pos_ref: (1, 2*npf, S)   f32
    npf = idt_ref.shape[0]
    ye = yx_ref[0, 0:1, :]                                   # (1, S)
    xe = yx_ref[0, 1:2, :]                                   # (1, S)
    idt = idt_ref[...]                                       # (npf, 1)
    phase = ph_ref[...]                                      # (npf, 1)
    # sin(v + 0) for even k, sin(v + pi/2) == cos(v) for odd k  -> one EUP op
    # per element instead of sin + cos + select.
    pos_ref[0, 0:npf, :] = jnp.sin(ye * idt + phase)         # pos_y
    pos_ref[0, npf:2 * npf, :] = jnp.sin(xe * idt + phase)   # pos_x


def position_embedding_sine(mask, *, num_pos_feats=16, temperature=10000.0,
                            normalize=True, scale=None):
    """mask: (B, Hf, Wf) bool, True = padding. Returns (B, 2*npf, Hf, Wf) f32."""
    if scale is None:
        scale = 2.0 * math.pi
    B, Hf, Wf = mask.shape
    S = Hf * Wf
    not_mask = (~mask).astype(jnp.float32)
    # mask-only cumsum/normalize is tiny -> XLA glue; transcendental-heavy part
    # runs in the Pallas kernel.
    y_embed = jnp.cumsum(not_mask, axis=1)
    x_embed = jnp.cumsum(not_mask, axis=2)
    if normalize:
        eps = 1e-6
        y_embed = y_embed / (y_embed[:, -1:, :] + eps) * scale
        x_embed = x_embed / (x_embed[:, :, -1:] + eps) * scale
    yx = jnp.stack([y_embed.reshape(B, S), x_embed.reshape(B, S)], axis=1)

    k = jnp.arange(num_pos_feats)
    dim_t = temperature ** ((2 * (k // 2)).astype(jnp.float32) / num_pos_feats)
    inv_dim_t = (1.0 / dim_t).reshape(num_pos_feats, 1).astype(jnp.float32)
    phase = ((k % 2).astype(jnp.float32) * (math.pi / 2.0)).reshape(num_pos_feats, 1)

    cost = pl.CostEstimate(
        flops=2 * B * 2 * num_pos_feats * S,
        transcendentals=B * 2 * num_pos_feats * S,
        bytes_accessed=(yx.size * 4 + inv_dim_t.size * 4 + phase.size * 4
                        + B * 2 * num_pos_feats * S * 4))

    pos = pl.pallas_call(
        _pos_sine_kernel,
        out_shape=jax.ShapeDtypeStruct((B, 2 * num_pos_feats, S), jnp.float32),
        grid_spec=pltpu.PrefetchScalarGridSpec(
            num_scalar_prefetch=0,
            grid=(B,),
            in_specs=[
                pl.BlockSpec((1, 2, S), lambda b: (b, 0, 0)),
                pl.BlockSpec((num_pos_feats, 1), lambda b: (0, 0)),
                pl.BlockSpec((num_pos_feats, 1), lambda b: (0, 0)),
            ],
            out_specs=pl.BlockSpec((1, 2 * num_pos_feats, S), lambda b: (b, 0, 0)),
        ),
        compiler_params=pltpu.CompilerParams(
            dimension_semantics=("parallel",),
            vmem_limit_bytes=32 * 1024 * 1024),
        cost_estimate=cost,
    )(yx, inv_dim_t, phase)
    return pos.reshape(B, 2 * num_pos_feats, Hf, Wf)         # NCHW directly


# ----------------------------------------------------------------------------
# Backbone + Joiner (glue; all heavy compute goes through the Pallas kernels)
# ----------------------------------------------------------------------------
class SimpleBackbone:
    """Two-level strided-conv backbone returning {level: (features_NCHW, mask)}."""

    CP = 128   # lane-dense channel padding for conv outputs

    def __init__(self, key, in_ch, chs=(32, 64)):
        k1, k2, k3, k4 = jax.random.split(key, 4)
        self.chs = chs
        self.w1 = 0.05 * jax.random.normal(k1, (chs[0], in_ch, 3, 3), jnp.float32)
        self.b1 = 0.05 * jax.random.normal(k2, (chs[0],), jnp.float32)
        self.w2 = 0.05 * jax.random.normal(k3, (chs[1], chs[0], 3, 3), jnp.float32)
        self.b2 = 0.05 * jax.random.normal(k4, (chs[1],), jnp.float32)
        # conv1 consumes raw channels; conv2 consumes the 128-padded activation
        self.w1k, self.b1k = _prep_conv_params(self.w1, self.b1, in_ch, self.CP)
        self.w2k, self.b2k = _prep_conv_params(self.w2, self.b2, self.CP, self.CP)

    def __call__(self, tensors_nchw, mask):
        x_nhwc = jnp.transpose(tensors_nchw, (0, 2, 3, 1))   # single entry transpose
        f1p = conv3x3_s2_pallas(x_nhwc, self.w1k, self.b1k, relu=True)  # (B,H/2,W/2,128)
        f2p = conv3x3_s2_pallas(f1p, self.w2k, self.b2k, relu=True)     # (B,H/4,W/4,128)
        # module-boundary conversion only: slice real channels, go to NCHW
        f1 = jnp.transpose(f1p[..., :self.chs[0]], (0, 3, 1, 2))
        f2 = jnp.transpose(f2p[..., :self.chs[1]], (0, 3, 1, 2))
        m1 = mask[:, ::2, ::2]
        m2 = m1[:, ::2, ::2]
        return {"0": (f1, m1), "1": (f2, m2)}


class Joiner:
    """JAX/Pallas port of chatrex.upn.models.backbone.wrapper.Joiner."""

    def __init__(self, backbone, pos_embed_fn):
        self.backbone = backbone
        self.pos_embed = pos_embed_fn

    def __call__(self, tensors, mask):
        xs = self.backbone(tensors, mask)
        out, pos = [], []
        for _layer_idx, (feat, m) in xs.items():
            out.append((feat, m))
            pos.append(self.pos_embed(m).astype(feat.dtype))
        return out, pos

    def forward_pos_embed_only(self, tensors, mask):
        return self.pos_embed(mask)


# ----------------------------------------------------------------------------
# Pure-JAX references (correctness check only)
# ----------------------------------------------------------------------------
def _conv_ref(x_nchw, w, b):
    y = jax.lax.conv_general_dilated(
        x_nchw, w, window_strides=(2, 2), padding=((1, 1), (1, 1)),
        dimension_numbers=("NCHW", "OIHW", "NCHW"))
    return jnp.maximum(y + b[None, :, None, None], 0.0)


def _pos_sine_ref(mask, num_pos_feats=16, temperature=10000.0, normalize=True,
                  scale=2.0 * math.pi):
    B, H, W = mask.shape
    not_mask = (~mask).astype(jnp.float32)
    y_embed = jnp.cumsum(not_mask, axis=1)
    x_embed = jnp.cumsum(not_mask, axis=2)
    if normalize:
        eps = 1e-6
        y_embed = y_embed / (y_embed[:, -1:, :] + eps) * scale
        x_embed = x_embed / (x_embed[:, :, -1:] + eps) * scale
    k = jnp.arange(num_pos_feats)
    dim_t = temperature ** ((2 * (k // 2)).astype(jnp.float32) / num_pos_feats)
    pos_x = x_embed[:, :, :, None] / dim_t
    pos_y = y_embed[:, :, :, None] / dim_t
    pos_x = jnp.stack([jnp.sin(pos_x[..., 0::2]), jnp.cos(pos_x[..., 1::2])],
                      axis=4).reshape(B, H, W, num_pos_feats)
    pos_y = jnp.stack([jnp.sin(pos_y[..., 0::2]), jnp.cos(pos_y[..., 1::2])],
                      axis=4).reshape(B, H, W, num_pos_feats)
    pos = jnp.concatenate([pos_y, pos_x], axis=3)
    return jnp.transpose(pos, (0, 3, 1, 2))


# ----------------------------------------------------------------------------
if __name__ == "__main__":
    key = jax.random.PRNGKey(0)
    kx, kb = jax.random.split(key)

    B, C, H, W = 2, 4, 16, 16
    x = jax.random.normal(kx, (B, C, H, W), jnp.float32)
    # padding mask (True = padded); batch element 1 has right/bottom padding
    hh = jnp.arange(H)[:, None]
    ww = jnp.arange(W)[None, :]
    mask = jnp.stack([jnp.zeros((H, W), bool), (hh >= 12) | (ww >= 12)], axis=0)

    backbone = SimpleBackbone(kb, in_ch=C, chs=(32, 64))
    pos_fn = partial(position_embedding_sine, num_pos_feats=16,
                     temperature=10000.0, normalize=True)
    joiner = Joiner(backbone, pos_fn)

    out, pos = joiner(x, mask)

    expected = {
        0: ((B, 32, H // 2, W // 2), (B, 32, H // 2, W // 2)),
        1: ((B, 64, H // 4, W // 4), (B, 32, H // 4, W // 4)),
    }
    for lvl, ((feat, m), p) in enumerate(zip(out, pos)):
        feat = jax.block_until_ready(feat)
        p = jax.block_until_ready(p)
        assert feat.shape == expected[lvl][0], (lvl, feat.shape)
        assert p.shape == expected[lvl][1], (lvl, p.shape)
        assert p.dtype == feat.dtype
        assert bool(jnp.all(jnp.isfinite(feat))) and bool(jnp.all(jnp.isfinite(p)))

    # numerical check against pure-JAX references (bf16 MXU path -> loose tol)
    f1_ref = _conv_ref(x, backbone.w1, backbone.b1)
    f2_ref = _conv_ref(f1_ref, backbone.w2, backbone.b2)
    assert float(jnp.max(jnp.abs(out[0][0] - f1_ref))) < 5e-2
    assert float(jnp.max(jnp.abs(out[1][0] - f2_ref))) < 5e-2
    assert float(jnp.max(jnp.abs(pos[0] - _pos_sine_ref(out[0][1])))) < 1e-3
    assert float(jnp.max(jnp.abs(pos[1] - _pos_sine_ref(out[1][1])))) < 1e-3

    # also exercise forward_pos_embed_only on the coarsest mask
    p_only = jax.block_until_ready(
        joiner.forward_pos_embed_only(out[1][0], out[1][1]))
    assert p_only.shape == (B, 32, H // 4, W // 4)

    print("KERNEL_OK")
</pallas_src>

<mosaic_0001>
module attributes {stable_mosaic.version = 11 : i64} {
  func.func @_conv3x3s2_kernel(%arg0: i32, %arg1: memref<4x9x9x4xbf16, #tpu.memory_space<vmem>>, %arg2: memref<36x128xbf16, #tpu.memory_space<vmem>>, %arg3: memref<1x128xf32, #tpu.memory_space<vmem>>, %arg4: memref<1x64x128xf32, #tpu.memory_space<vmem>>, %arg5: memref<64x36xbf16, #tpu.memory_space<vmem>>) attributes {dimension_semantics = [#tpu.dimension_semantics<parallel>], iteration_bounds = array<i64: 2>, scalar_prefetch = 0 : i64, scratch_operands = 1 : i64, tpu.core_type = #tpu.core_type<tc>, window_params = [{transform_indices = @transform_0, window_bounds = array<i64: 4, 9, 9, 4>}, {pipeline_mode = #tpu.pipeline_mode<synchronous>, transform_indices = @transform_1, window_bounds = array<i64: 36, 128>}, {pipeline_mode = #tpu.pipeline_mode<synchronous>, transform_indices = @transform_2, window_bounds = array<i64: 1, 128>}, {transform_indices = @transform_3, window_bounds = array<i64: 1, 64, 128>}]} {
    %c0 = arith.constant 0 : index
    %c0_0 = arith.constant 0 : index
    %c0_1 = arith.constant 0 : index
    %c0_2 = arith.constant 0 : index
    %0 = vector.load %arg1[%c0, %c0_0, %c0_1, %c0_2] : memref<4x9x9x4xbf16, #tpu.memory_space<vmem>>, vector<1x1x8x4xbf16>
    %1 = vector.shape_cast %0 : vector<1x1x8x4xbf16> to vector<8x4xbf16>
    %c0_3 = arith.constant 0 : index
    %c0_4 = arith.constant 0 : index
    %2 = vector.load %arg5[%c0_3, %c0_4] : memref<64x36xbf16, #tpu.memory_space<vmem>>, vector<8x4xbf16>
    tpu.vector_store %arg5[%c0_3, %c0_4], %1 {strides = array<i32>} : memref<64x36xbf16, #tpu.memory_space<vmem>>, vector<8x4xbf16>,
    %c0_5 = arith.constant 0 : index
    %c1 = arith.constant 1 : index
    %c0_6 = arith.constant 0 : index
    %c0_7 = arith.constant 0 : index
    %3 = vector.load %arg1[%c0_5, %c1, %c0_6, %c0_7] : memref<4x9x9x4xbf16, #tpu.memory_space<vmem>>, vector<1x1x8x4xbf16>
    %4 = vector.shape_cast %3 : vector<1x1x8x4xbf16> to vector<8x4xbf16>
    %c8 = arith.constant 8 : index
    %c0_8 = arith.constant 0 : index
    %5 = vector.load %arg5[%c8, %c0_8] : memref<64x36xbf16, #tpu.memory_space<vmem>>, vector<8x4xbf16>
    tpu.vector_store %arg5[%c8, %c0_8], %4 {strides = array<i32>} : memref<64x36xbf16, #tpu.memory_space<vmem>>, vector<8x4xbf16>,
    %c0_9 = arith.constant 0 : index
    %c2 = arith.constant 2 : index
    %c0_10 = arith.constant 0 : index
    %c0_11 = arith.constant 0 : index
    %6 = vector.load %arg1[%c0_9, %c2, %c0_10, %c0_11] : memref<4x9x9x4xbf16, #tpu.memory_space<vmem>>, vector<1x1x8x4xbf16>
    %7 = vector.shape_cast %6 : vector<1x1x8x4xbf16> to vector<8x4xbf16>
    %c16 = arith.constant 16 : index
    %c0_12 = arith.constant 0 : index
    %8 = vector.load %arg5[%c16, %c0_12] : memref<64x36xbf16, #tpu.memory_space<vmem>>, vector<8x4xbf16>
    tpu.vector_store %arg5[%c16, %c0_12], %7 {strides = array<i32>} : memref<64x36xbf16, #tpu.memory_space<vmem>>, vector<8x4xbf16>,
    %c0_13 = arith.constant 0 : index
    %c3 = arith.constant 3 : index
    %c0_14 = arith.constant 0 : index
    %c0_15 = arith.constant 0 : index
    %9 = vector.load %arg1[%c0_13, %c3, %c0_14, %c0_15] : memref<4x9x9x4xbf16, #tpu.memory_space<vmem>>, vector<1x1x8x4xbf16>
    %10 = vector.shape_cast %9 : vector<1x1x8x4xbf16> to vector<8x4xbf16>
    %c24 = arith.constant 24 : index
    %c0_16 = arith.constant 0 : index
    %11 = vector.load %arg5[%c24, %c0_16] : memref<64x36xbf16, #tpu.memory_space<vmem>>, vector<8x4xbf16>
    tpu.vector_store %arg5[%c24, %c0_16], %10 {strides = array<i32>} : memref<64x36xbf16, #tpu.memory_space<vmem>>, vector<8x4xbf16>,
    %c0_17 = arith.constant 0 : index
    %c4 = arith.constant 4 : index
    %c0_18 = arith.constant 0 : index
    %c0_19 = arith.constant 0 : index
    %12 = vector.load %arg1[%c0_17, %c4, %c0_18, %c0_19] : memref<4x9x9x4xbf16, #tpu.memory_space<vmem>>, vector<1x1x8x4xbf16>
    %13 = vector.shape_cast %12 : vector<1x1x8x4xbf16> to vector<8x4xbf16>
    %c32 = arith.constant 32 : index
    %c0_20 = arith.constant 0 : index
    %14 = vector.load %arg5[%c32, %c0_20] : memref<64x36xbf16, #tpu.memory_space<vmem>>, vector<8x4xbf16>
    tpu.vector_store %arg5[%c32, %c0_20], %13 {strides = array<i32>} : memref<64x36xbf16, #tpu.memory_space<vmem>>, vector<8x4xbf16>,
    %c0_21 = arith.constant 0 : index
    %c5 = arith.constant 5 : index
    %c0_22 = arith.constant 0 : index
    %c0_23 = arith.constant 0 : index
    %15 = vector.load %arg1[%c0_21, %c5, %c0_22, %c0_23] : memref<4x9x9x4xbf16, #tpu.memory_space<vmem>>, vector<1x1x8x4xbf16>
    %16 = vector.shape_cast %15 : vector<1x1x8x4xbf16> to vector<8x4xbf16>
    %c40 = arith.constant 40 : index
    %c0_24 = arith.constant 0 : index
    %17 = vector.load %arg5[%c40, %c0_24] : memref<64x36xbf16, #tpu.memory_space<vmem>>, vector<8x4xbf16>
    tpu.vector_store %arg5[%c40, %c0_24], %16 {strides = array<i32>} : memref<64x36xbf16, #tpu.memory_space<vmem>>, vector<8x4xbf16>,
    %c0_25 = arith.constant 0 : index
    %c6 = arith.constant 6 : index
    %c0_26 = arith.constant 0 : index
    %c0_27 = arith.constant 0 : index
    %18 = vector.load %arg1[%c0_25, %c6, %c0_26, %c0_27] : memref<4x9x9x4xbf16, #tpu.memory_space<vmem>>, vector<1x1x8x4xbf16>
    %19 = vector.shape_cast %18 : vector<1x1x8x4xbf16> to vector<8x4xbf16>
    %c48 = arith.constant 48 : index
    %c0_28 = arith.constant 0 : index
    %20 = vector.load %arg5[%c48, %c0_28] : memref<64x36xbf16, #tpu.memory_space<vmem>>, vector<8x4xbf16>
    tpu.vector_store %arg5[%c48, %c0_28], %19 {strides = array<i32>} : memref<64x36xbf16, #tpu.memory_space<vmem>>, vector<8x4xbf16>,
    %c0_29 = arith.constant 0 : index
    %c7 = arith.constant 7 : index
    %c0_30 = arith.constant 0 : index
    %c0_31 = arith.constant 0 : index
    %21 = vector.load %arg1[%c0_29, %c7, %c0_30, %c0_31] : memref<4x9x9x4xbf16, #tpu.memory_space<vmem>>, vector<1x1x8x4xbf16>
    %22 = vector.shape_cast %21 : vector<1x1x8x4xbf16> to vector<8x4xbf16>
    %c56 = arith.constant 56 : index
    %c0_32 = arith.constant 0 : index
    %23 = vector.load %arg5[%c56, %c0_32] : memref<64x36xbf16, #tpu.memory_space<vmem>>, vector<8x4xbf16>
    tpu.vector_store %arg5[%c56, %c0_32], %22 {strides = array<i32>} : memref<64x36xbf16, #tpu.memory_space<vmem>>, vector<8x4xbf16>,
    %c1_33 = arith.constant 1 : index
    %c0_34 = arith.constant 0 : index
    %c0_35 = arith.constant 0 : index
    %c0_36 = arith.constant 0 : index
    %24 = vector.load %arg1[%c1_33, %c0_34, %c0_35, %c0_36] : memref<4x9x9x4xbf16, #tpu.memory_space<vmem>>, vector<1x1x8x4xbf16>
    %25 = vector.shape_cast %24 : vector<1x1x8x4xbf16> to vector<8x4xbf16>
    %c0_37 = arith.constant 0 : index
    %c4_38 = arith.constant 4 : index
    %26 = vector.load %arg5[%c0_37, %c4_38] : memref<64x36xbf16, #tpu.memory_space<vmem>>, vector<8x4xbf16>
    tpu.vector_store %arg5[%c0_37, %c4_38], %25 {strides = array<i32>} : memref<64x36xbf16, #tpu.memory_space<vmem>>, vector<8x4xbf16>,
    %c1_39 = arith.constant 1 : index
    %c1_40 = arith.constant 1 : index
    %c0_41 = arith.constant 0 : index
    %c0_42 = arith.constant 0 : index
    %27 = vector.load %arg1[%c1_39, %c1_40, %c0_41, %c0_42] : memref<4x9x9x4xbf16, #tpu.memory_space<vmem>>, vector<1x1x8x4xbf16>
    %28 = vector.shape_cast %27 : vector<1x1x8x4xbf16> to vector<8x4xbf16>
    %c8_43 = arith.constant 8 : index
    %c4_44 = arith.constant 4 : index
    %29 = vector.load %arg5[%c8_43, %c4_44] : memref<64x36xbf16, #tpu.memory_space<vmem>>, vector<8x4xbf16>
    tpu.vector_store %arg5[%c8_43, %c4_44], %28 {strides = array<i32>} : memref<64x36xbf16, #tpu.memory_space<vmem>>, vector<8x4xbf16>,
    %c1_45 = arith.constant 1 : index
    %c2_46 = arith.constant 2 : index
    %c0_47 = arith.constant 0 : index
    %c0_48 = arith.constant 0 : index
    %30 = vector.load %arg1[%c1_45, %c2_46, %c0_47, %c0_48] : memref<4x9x9x4xbf16, #tpu.memory_space<vmem>>, vector<1x1x8x4xbf16>
    %31 = vector.shape_cast %30 : vector<1x1x8x4xbf16> to vector<8x4xbf16>
    %c16_49 = arith.constant 16 : index
    %c4_50 = arith.constant 4 : index
    %32 = vector.load %arg5[%c16_49, %c4_50] : memref<64x36xbf16, #tpu.memory_space<vmem>>, vector<8x4xbf16>
    tpu.vector_store %arg5[%c16_49, %c4_50], %31 {strides = array<i32>} : memref<64x36xbf16, #tpu.memory_space<vmem>>, vector<8x4xbf16>,
    %c1_51 = arith.constant 1 : index
    %c3_52 = arith.constant 3 : index
    %c0_53 = arith.constant 0 : index
    %c0_54 = arith.constant 0 : index
    %33 = vector.load %arg1[%c1_51, %c3_52, %c0_53, %c0_54] : memref<4x9x9x4xbf16, #tpu.memory_space<vmem>>, vector<1x1x8x4xbf16>
    %34 = vector.shape_cast %33 : vector<1x1x8x4xbf16> to vector<8x4xbf16>
    %c24_55 = arith.constant 24 : index
    %c4_56 = arith.constant 4 : index
    %35 = vector.load %arg5[%c24_55, %c4_56] : memref<64x36xbf16, #tpu.memory_space<vmem>>, vector<8x4xbf16>
    tpu.vector_store %arg5[%c24_55, %c4_56], %34 {strides = array<i32>} : memref<64x36xbf16, #tpu.memory_space<vmem>>, vector<8x4xbf16>,
    %c1_57 = arith.constant 1 : index
    %c4_58 = arith.constant 4 : index
    %c0_59 = arith.constant 0 : index
    %c0_60 = arith.constant 0 : index
    %36 = vector.load %arg1[%c1_57, %c4_58, %c0_59, %c0_60] : memref<4x9x9x4xbf16, #tpu.memory_space<vmem>>, vector<1x1x8x4xbf16>
    %37 = vector.shape_cast %36 : vector<1x1x8x4xbf16> to vector<8x4xbf16>
    %c32_61 = arith.constant 32 : index
    %c4_62 = arith.constant 4 : index
    %38 = vector.load %arg5[%c32_61, %c4_62] : memref<64x36xbf16, #tpu.memory_space<vmem>>, vector<8x4xbf16>
    tpu.vector_store %arg5[%c32_61, %c4_62], %37 {strides = array<i32>} : memref<64x36xbf16, #tpu.memory_space<vmem>>, vector<8x4xbf16>,
    %c1_63 = arith.constant 1 : index
    %c5_64 = arith.constant 5 : index
    %c0_65 = arith.constant 0 : index
    %c0_66 = arith.constant 0 : index
    %39 = vector.load %arg1[%c1_63, %c5_64, %c0_65, %c0_66] : memref<4x9x9x4xbf16, #tpu.memory_space<vmem>>, vector<1x1x8x4xbf16>
    %40 = vector.shape_cast %39 : vector<1x1x8x4xbf16> to vector<8x4xbf16>
    %c40_67 = arith.constant 40 : index
    %c4_68 = arith.constant 4 : index
    %41 = vector.load %arg5[%c40_67, %c4_68] : memref<64x36xbf16, #tpu.memory_space<vmem>>, vector<8x4xbf16>
    tpu.vector_store %arg5[%c40_67, %c4_68], %40 {strides = array<i32>} : memref<64x36xbf16, #tpu.memory_space<vmem>>, vector<8x4xbf16>,
    %c1_69 = arith.constant 1 : index
    %c6_70 = arith.constant 6 : index
    %c0_71 = arith.constant 0 : index
    %c0_72 = arith.constant 0 : index
    %42 = vector.load %arg1[%c1_69, %c6_70, %c0_71, %c0_72] : memref<4x9x9x4xbf16, #tpu.memory_space<vmem>>, vector<1x1x8x4xbf16>
    %43 = vector.shape_cast %42 : vector<1x1x8x4xbf16> to vector<8x4xbf16>
    %c48_73 = arith.constant 48 : index
    %c4_74 = arith.constant 4 : index
    %44 = vector.load %arg5[%c48_73, %c4_74] : memref<64x36xbf16, #tpu.memory_space<vmem>>, vector<8x4xbf16>
    tpu.vector_store %arg5[%c48_73, %c4_74], %43 {strides = array<i32>} : memref<64x36xbf16, #tpu.memory_space<vmem>>, vector<8x4xbf16>,
    %c1_75 = arith.constant 1 : index
    %c7_76 = arith.constant 7 : index
    %c0_77 = arith.constant 0 : index
    %c0_78 = arith.constant 0 : index
    %45 = vector.load %arg1[%c1_75, %c7_76, %c0_77, %c0_78] : memref<4x9x9x4xbf16, #tpu.memory_space<vmem>>, vector<1x1x8x4xbf16>
    %46 = vector.shape_cast %45 : vector<1x1x8x4xbf16> to vector<8x4xbf16>
    %c56_79 = arith.constant 56 : index
    %c4_80 = arith.constant 4 : index
    %47 = vector.load %arg5[%c56_79, %c4_80] : memref<64x36xbf16, #tpu.memory_space<vmem>>, vector<8x4xbf16>
    tpu.vector_store %arg5[%c56_79, %c4_80], %46 {strides = array<i32>} : memref<64x36xbf16, #tpu.memory_space<vmem>>, vector<8x4xbf16>,
    %c0_81 = arith.constant 0 : index
    %c0_82 = arith.constant 0 : index
    %c1_83 = arith.constant 1 : index
    %c0_84 = arith.constant 0 : index
    %48 = vector.load %arg1[%c0_81, %c0_82, %c1_83, %c0_84] : memref<4x9x9x4xbf16, #tpu.memory_space<vmem>>, vector<1x1x8x4xbf16>
    %49 = vector.shape_cast %48 : vector<1x1x8x4xbf16> to vector<8x4xbf16>
    %c0_85 = arith.constant 0 : index
    %c8_86 = arith.constant 8 : index
    %50 = vector.load %arg5[%c0_85, %c8_86] : memref<64x36xbf16, #tpu.memory_space<vmem>>, vector<8x4xbf16>
    tpu.vector_store %arg5[%c0_85, %c8_86], %49 {strides = array<i32>} : memref<64x36xbf16, #tpu.memory_space<vmem>>, vector<8x4xbf16>,
    %c0_87 = arith.constant 0 : index
    %c1_88 = arith.constant 1 : index
    %c1_89 = arith.constant 1 : index
    %c0_90 = arith.constant 0 : index
    %51 = vector.load %arg1[%c0_87, %c1_88, %c1_89, %c0_90] : memref<4x9x9x4xbf16, #tpu.memory_space<vmem>>, vector<1x1x8x4xbf16>
    %52 = vector.shape_cast %51 : vector<1x1x8x4xbf16> to vector<8x4xbf16>
    %c8_91 = arith.constant 8 : index
    %c8_92 = arith.constant 8 : index
    %53 = vector.load %arg5[%c8_91, %c8_92] : memref<64x36xbf16, #tpu.memory_space<vmem>>, vector<8x4xbf16>
    tpu.vector_store %arg5[%c8_91, %c8_92], %52 {strides = array<i32>} : memref<64x36xbf16, #tpu.memory_space<vmem>>, vector<8x4xbf16>,
    %c0_93 = arith.constant 0 : index
    %c2_94 = arith.constant 2 : index
    %c1_95 = arith.constant 1 : index
    %c0_96 = arith.constant 0 : index
    %54 = vector.load %arg1[%c0_93, %c2_94, %c1_95, %c0_96] : memref<4x9x9x4xbf16, #tpu.memory_space<vmem>>, vector<1x1x8x4xbf16>
    %55 = vector.shape_cast %54 : vector<1x1x8x4xbf16> to vector<8x4xbf16>
    %c16_97 = arith.constant 16 : index
    %c8_98 = arith.constant 8 : index
    %56 = vector.load %arg5[%c16_97, %c8_98] : memref<64x36xbf16, #tpu.memory_space<vmem>>, vector<8x4xbf16>
    tpu.vector_store %arg5[%c16_97, %c8_98], %55 {strides = array<i32>} : memref<64x36xbf16, #tpu.memory_space<vmem>>, vector<8x4xbf16>,
    %c0_99 = arith.constant 0 : index
    %c3_100 = arith.constant 3 : index
    %c1_101 = arith.constant 1 : index
    %c0_102 = arith.constant 0 : index
    %57 = vector.load %arg1[%c0_99, %c3_100, %c1_101, %c0_102] : memref<4x9x9x4xbf16, #tpu.memory_space<vmem>>, vector<1x1x8x4xbf16>
    %58 = vector.shape_cast %57 : vector<1x1x8x4xbf16> to vector<8x4xbf16>
    %c24_103 = arith.constant 24 : index
    %c8_104 = arith.constant 8 : index
    %59 = vector.load %arg5[%c24_103, %c8_104] : memref<64x36xbf16, #tpu.memory_space<vmem>>, vector<8x4xbf16>
    tpu.vector_store %arg5[%c24_103, %c8_104], %58 {strides = array<i32>} : memref<64x36xbf16, #tpu.memory_space<vmem>>, vector<8x4xbf16>,
    %c0_105 = arith.constant 0 : index
    %c4_106 = arith.constant 4 : index
    %c1_107 = arith.constant 1 : index
    %c0_108 = arith.constant 0 : index
    %60 = vector.load %arg1[%c0_105, %c4_106, %c1_107, %c0_108] : memref<4x9x9x4xbf16, #tpu.memory_space<vmem>>, vector<1x1x8x4xbf16>
    %61 = vector.shape_cast %60 : vector<1x1x8x4xbf16> to vector<8x4xbf16>
    %c32_109 = arith.constant 32 : index
    %c8_110 = arith.constant 8 : index
    %62 = vector.load %arg5[%c32_109, %c8_110] : memref<64x36xbf16, #tpu.memory_space<vmem>>, vector<8x4xbf16>
    tpu.vector_store %arg5[%c32_109, %c8_110], %61 {strides = array<i32>} : memref<64x36xbf16, #tpu.memory_space<vmem>>, vector<8x4xbf16>,
    %c0_111 = arith.constant 0 : index
    %c5_112 = arith.constant 5 : index
    %c1_113 = arith.constant 1 : index
    %c0_114 = arith.constant 0 : index
    %63 = vector.load %arg1[%c0_111, %c5_112, %c1_113, %c0_114] : memref<4x9x9x4xbf16, #tpu.memory_space<vmem>>, vector<1x1x8x4xbf16>
    %64 = vector.shape_cast %63 : vector<1x1x8x4xbf16> to vector<8x4xbf16>
    %c40_115 = arith.constant 40 : index
    %c8_116 = arith.constant 8 : index
    %65 = vector.load %arg5[%c40_115, %c8_116] : memref<64x36xbf16, #tpu.memory_space<vmem>>, vector<8x4xbf16>
    tpu.vector_store %arg5[%c40_115, %c8_116], %64 {strides = array<i32>} : memref<64x36xbf16, #tpu.memory_space<vmem>>, vector<8x4xbf16>,
    %c0_117 = arith.constant 0 : index
    %c6_118 = arith.constant 6 : index
    %c1_119 = arith.constant 1 : index
    %c0_120 = arith.constant 0 : index
    %66 = vector.load %arg1[%c0_117, %c6_118, %c1_119, %c0_120] : memref<4x9x9x4xbf16, #tpu.memory_space<vmem>>, vector<1x1x8x4xbf16>
    %67 = vector.shape_cast %66 : vector<1x1x8x4xbf16> to vector<8x4xbf16>
    %c48_121 = arith.constant 48 : index
    %c8_122 = arith.constant 8 : index
    %68 = vector.load %arg5[%c48_121, %c8_122] : memref<64x36xbf16, #tpu.memory_space<vmem>>, vector<8x4xbf16>
    tpu.vector_store %arg5[%c48_121, %c8_122], %67 {strides = array<i32>} : memref<64x36xbf16, #tpu.memory_space<vmem>>, vector<8x4xbf16>,
    %c0_123 = arith.constant 0 : index
    %c7_124 = arith.constant 7 : index
    %c1_125 = arith.constant 1 : index
    %c0_126 = arith.constant 0 : index
    %69 = vector.load %arg1[%c0_123, %c7_124, %c1_125, %c0_126] : memref<4x9x9x4xbf16, #tpu.memory_space<vmem>>, vector<1x1x8x4xbf16>
    %70 = vector.shape_cast %69 : vector<1x1x8x4xbf16> to vector<8x4xbf16>
    %c56_127 = arith.constant 56 : index
    %c8_128 = arith.constant 8 : index
    %71 = vector.load %arg5[%c56_127, %c8_128] : memref<64x36xbf16, #tpu.memory_space<vmem>>, vector<8x4xbf16>
    tpu.vector_store %arg5[%c56_127, %c8_128], %70 {strides = array<i32>} : memref<64x36xbf16, #tpu.memory_space<vmem>>, vector<8x4xbf16>,
    %c2_129 = arith.constant 2 : index
    %c0_130 = arith.constant 0 : index
    %c0_131 = arith.constant 0 : index
    %c0_132 = arith.constant 0 : index
    %72 = vector.load %arg1[%c2_129, %c0_130, %c0_131, %c0_132] : memref<4x9x9x4xbf16, #tpu.memory_space<vmem>>, vector<1x1x8x4xbf16>
    %73 = vector.shape_cast %72 : vector<1x1x8x4xbf16> to vector<8x4xbf16>
    %c0_133 = arith.constant 0 : index
    %c12 = arith.constant 12 : index
    %74 = vector.load %arg5[%c0_133, %c12] : memref<64x36xbf16, #tpu.memory_space<vmem>>, vector<8x4xbf16>
    tpu.vector_store %arg5[%c0_133, %c12], %73 {strides = array<i32>} : memref<64x36xbf16, #tpu.memory_space<vmem>>, vector<8x4xbf16>,
    %c2_134 = arith.constant 2 : index
    %c1_135 = arith.constant 1 : index
    %c0_136 = arith.constant 0 : index
    %c0_137 = arith.constant 0 : index
    %75 = vector.load %arg1[%c2_134, %c1_135, %c0_136, %c0_137] : memref<4x9x9x4xbf16, #tpu.memory_space<vmem>>, vector<1x1x8x4xbf16>
    %76 = vector.shape_cast %75 : vector<1x1x8x4xbf16> to vector<8x4xbf16>
    %c8_138 = arith.constant 8 : index
    %c12_139 = arith.constant 12 : index
    %77 = vector.load %arg5[%c8_138, %c12_139] : memref<64x36xbf16, #tpu.memory_space<vmem>>, vector<8x4xbf16>
    tpu.vector_store %arg5[%c8_138, %c12_139], %76 {strides = array<i32>} : memref<64x36xbf16, #tpu.memory_space<vmem>>, vector<8x4xbf16>,
    %c2_140 = arith.constant 2 : index
    %c2_141 = arith.constant 2 : index
    %c0_142 = arith.constant 0 : index
    %c0_143 = arith.constant 0 : index
    %78 = vector.load %arg1[%c2_140, %c2_141, %c0_142, %c0_143] : memref<4x9x9x4xbf16, #tpu.memory_space<vmem>>, vector<1x1x8x4xbf16>
    %79 = vector.shape_cast %78 : vector<1x1x8x4xbf16> to vector<8x4xbf16>
    %c16_144 = arith.constant 16 : index
    %c12_145 = arith.constant 12 : index
    %80 = vector.load %arg5[%c16_144, %c12_145] : memref<64x36xbf16, #tpu.memory_space<vmem>>, vector<8x4xbf16>
    tpu.vector_store %arg5[%c16_144, %c12_145], %79 {strides = array<i32>} : memref<64x36xbf16, #tpu.memory_space<vmem>>, vector<8x4xbf16>,
    %c2_146 = arith.constant 2 : index
    %c3_147 = arith.constant 3 : index
    %c0_148 = arith.constant 0 : index
    %c0_149 = arith.constant 0 : index
    %81 = vector.load %arg1[%c2_146, %c3_147, %c0_148, %c0_149] : memref<4x9x9x4xbf16, #tpu.memory_space<vmem>>, vector<1x1x8x4xbf16>
    %82 = vector.shape_cast %81 : vector<1x1x8x4xbf16> to vector<8x4xbf16>
    %c24_150 = arith.constant 24 : index
    %c12_151 = arith.constant 12 : index
    %83 = vector.load %arg5[%c24_150, %c12_151] : memref<64x36xbf16, #tpu.memory_space<vmem>>, vector<8x4xbf16>
    tpu.vector_store %arg5[%c24_150, %c12_151], %82 {strides = array<i32>} : memref<64x36xbf16, #tpu.memory_space<vmem>>, vector<8x4xbf16>,
    %c2_152 = arith.constant 2 : index
    %c4_153 = arith.constant 4 : index
    %c0_154 = arith.constant 0 : index
    %c0_155 = arith.constant 0 : index
    %84 = vector.load %arg1[%c2_152, %c4_153, %c0_154, %c0_155] : memref<4x9x9x4xbf16, #tpu.memory_space<vmem>>, vector<1x1x8x4xbf16>
    %85 = vector.shape_cast %84 : vector<1x1x8x4xbf16> to vector<8x4xbf16>
    %c32_156 = arith.constant 32 : index
    %c12_157 = arith.constant 12 : index
    %86 = vector.load %arg5[%c32_156, %c12_157] : memref<64x36xbf16, #tpu.memory_space<vmem>>, vector<8x4xbf16>
    tpu.vector_store %arg5[%c32_156, %c12_157], %85 {strides = array<i32>} : memref<64x36xbf16, #tpu.memory_space<vmem>>, vector<8x4xbf16>,
    %c2_158 = arith.constant 2 : index
    %c5_159 = arith.constant 5 : index
    %c0_160 = arith.constant 0 : index
    %c0_161 = arith.constant 0 : index
    %87 = vector.load %arg1[%c2_158, %c5_159, %c0_160, %c0_161] : memref<4x9x9x4xbf16, #tpu.memory_space<vmem>>, vector<1x1x8x4xbf16>
    %88 = vector.shape_cast %87 : vector<1x1x8x4xbf16> to vector<8x4xbf16>
    %c40_162 = arith.constant 40 : index
    %c12_163 = arith.constant 12 : index
    %89 = vector.load %arg5[%c40_162, %c12_163] : memref<64x36xbf16, #tpu.memory_space<vmem>>, vector<8x4xbf16>
    tpu.vector_store %arg5[%c40_162, %c12_163], %88 {strides = array<i32>} : memref<64x36xbf16, #tpu.memory_space<vmem>>, vector<8x4xbf16>,
    %c2_164 = arith.constant 2 : index
    %c6_165 = arith.constant 6 : index
    %c0_166 = arith.constant 0 : index
    %c0_167 = arith.constant 0 : index
    %90 = vector.load %arg1[%c2_164, %c6_165, %c0_166, %c0_167] : memref<4x9x9x4xbf16, #tpu.memory_space<vmem>>, vector<1x1x8x4xbf16>
    %91 = vector.shape_cast %90 : vector<1x1x8x4xbf16> to vector<8x4xbf16>
    %c48_168 = arith.constant 48 : index
    %c12_169 = arith.constant 12 : index
    %92 = vector.load %arg5[%c48_168, %c12_169] : memref<64x36xbf16, #tpu.memory_space<vmem>>, vector<8x4xbf16>
    tpu.vector_store %arg5[%c48_168, %c12_169], %91 {strides = array<i32>} : memref<64x36xbf16, #tpu.memory_space<vmem>>, vector<8x4xbf16>,
    %c2_170 = arith.constant 2 : index
    %c7_171 = arith.constant 7 : index
    %c0_172 = arith.constant 0 : index
    %c0_173 = arith.constant 0 : index
    %93 = vector.load %arg1[%c2_170, %c7_171, %c0_172, %c0_173] : memref<4x9x9x4xbf16, #tpu.memory_space<vmem>>, vector<1x1x8x4xbf16>
    %94 = vector.shape_cast %93 : vector<1x1x8x4xbf16> to vector<8x4xbf16>
    %c56_174 = arith.constant 56 : index
    %c12_175 = arith.constant 12 : index
    %95 = vector.load %arg5[%c56_174, %c12_175] : memref<64x36xbf16, #tpu.memory_space<vmem>>, vector<8x4xbf16>
    tpu.vector_store %arg5[%c56_174, %c12_175], %94 {strides = array<i32>} : memref<64x36xbf16, #tpu.memory_space<vmem>>, vector<8x4xbf16>,
    %c3_176 = arith.constant 3 : index
    %c0_177 = arith.constant 0 : index
    %c0_178 = arith.constant 0 : index
    %c0_179 = arith.constant 0 : index
    %96 = vector.load %arg1[%c3_176, %c0_177, %c0_178, %c0_179] : memref<4x9x9x4xbf16, #tpu.memory_space<vmem>>, vector<1x1x8x4xbf16>
    %97 = vector.shape_cast %96 : vector<1x1x8x4xbf16> to vector<8x4xbf16>
    %c0_180 = arith.constant 0 : index
    %c16_181 = arith.constant 16 : index
    %98 = vector.load %arg5[%c0_180, %c16_181] : memref<64x36xbf16, #tpu.memory_space<vmem>>, vector<8x4xbf16>
    tpu.vector_store %arg5[%c0_180, %c16_181], %97 {strides = array<i32>} : memref<64x36xbf16, #tpu.memory_space<vmem>>, vector<8x4xbf16>,
    %c3_182 = arith.constant 3 : index
    %c1_183 = arith.constant 1 : index
    %c0_184 = arith.constant 0 : index
    %c0_185 = arith.constant 0 : index
    %99 = vector.load %arg1[%c3_182, %c1_183, %c0_184, %c0_185] : memref<4x9x9x4xbf16, #tpu.memory_space<vmem>>, vector<1x1x8x4xbf16>
    %100 = vector.shape_cast %99 : vector<1x1x8x4xbf16> to vector<8x4xbf16>
    %c8_186 = arith.constant 8 : index
    %c16_187 = arith.constant 16 : index
    %101 = vector.load %arg5[%c8_186, %c16_187] : memref<64x36xbf16, #tpu.memory_space<vmem>>, vector<8x4xbf16>
    tpu.vector_store %arg5[%c8_186, %c16_187], %100 {strides = array<i32>} : memref<64x36xbf16, #tpu.memory_space<vmem>>, vector<8x4xbf16>,
    %c3_188 = arith.constant 3 : index
    %c2_189 = arith.constant 2 : index
    %c0_190 = arith.constant 0 : index
    %c0_191 = arith.constant 0 : index
    %102 = vector.load %arg1[%c3_188, %c2_189, %c0_190, %c0_191] : memref<4x9x9x4xbf16, #tpu.memory_space<vmem>>, vector<1x1x8x4xbf16>
    %103 = vector.shape_cast %102 : vector<1x1x8x4xbf16> to vector<8x4xbf16>
    %c16_192 = arith.constant 16 : index
    %c16_193 = arith.constant 16 : index
    %104 = vector.load %arg5[%c16_192, %c16_193] : memref<64x36xbf16, #tpu.memory_space<vmem>>, vector<8x4xbf16>
    tpu.vector_store %arg5[%c16_192, %c16_193], %103 {strides = array<i32>} : memref<64x36xbf16, #tpu.memory_space<vmem>>, vector<8x4xbf16>,
    %c3_194 = arith.constant 3 : index
    %c3_195 = arith.constant 3 : index
    %c0_196 = arith.constant 0 : index
    %c0_197 = arith.constant 0 : index
    %105 = vector.load %arg1[%c3_194, %c3_195, %c0_196, %c0_197] : memref<4x9x9x4xbf16, #tpu.memory_space<vmem>>, vector<1x1x8x4xbf16>
    %106 = vector.shape_cast %105 : vector<1x1x8x4xbf16> to vector<8x4xbf16>
    %c24_198 = arith.constant 24 : index
    %c16_199 = arith.constant 16 : index
    %107 = vector.load %arg5[%c24_198, %c16_199] : memref<64x36xbf16, #tpu.memory_space<vmem>>, vector<8x4xbf16>
    tpu.vector_store %arg5[%c24_198, %c16_199], %106 {strides = array<i32>} : memref<64x36xbf16, #tpu.memory_space<vmem>>, vector<8x4xbf16>,
    %c3_200 = arith.constant 3 : index
    %c4_201 = arith.constant 4 : index
    %c0_202 = arith.constant 0 : index
    %c0_203 = arith.constant 0 : index
    %108 = vector.load %arg1[%c3_200, %c4_201, %c0_202, %c0_203] : memref<4x9x9x4xbf16, #tpu.memory_space<vmem>>, vector<1x1x8x4xbf16>
    %109 = vector.shape_cast %108 : vector<1x1x8x4xbf16> to vector<8x4xbf16>
    %c32_204 = arith.constant 32 : index
    %c16_205 = arith.constant 16 : index
    %110 = vector.load %arg5[%c32_204, %c16_205] : memref<64x36xbf16, #tpu.memory_space<vmem>>, vector<8x4xbf16>
    tpu.vector_store %arg5[%c32_204, %c16_205], %109 {strides = array<i32>} : memref<64x36xbf16, #tpu.memory_space<vmem>>, vector<8x4xbf16>,
    %c3_206 = arith.constant 3 : index
    %c5_207 = arith.constant 5 : index
    %c0_208 = arith.constant 0 : index
    %c0_209 = arith.constant 0 : index
    %111 = vector.load %arg1[%c3_206, %c5_207, %c0_208, %c0_209] : memref<4x9x9x4xbf16, #tpu.memory_space<vmem>>, vector<1x1x8x4xbf16>
    %112 = vector.shape_cast %111 : vector<1x1x8x4xbf16> to vector<8x4xbf16>
    %c40_210 = arith.constant 40 : index
    %c16_211 = arith.constant 16 : index
    %113 = vector.load %arg5[%c40_210, %c16_211] : memref<64x36xbf16, #tpu.memory_space<vmem>>, vector<8x4xbf16>
    tpu.vector_store %arg5[%c40_210, %c16_211], %112 {strides = array<i32>} : memref<64x36xbf16, #tpu.memory_space<vmem>>, vector<8x4xbf16>,
    %c3_212 = arith.constant 3 : index
    %c6_213 = arith.constant 6 : index
    %c0_214 = arith.constant 0 : index
    %c0_215 = arith.constant 0 : index
    %114 = vector.load %arg1[%c3_212, %c6_213, %c0_214, %c0_215] : memref<4x9x9x4xbf16, #tpu.memory_space<vmem>>, vector<1x1x8x4xbf16>
    %115 = vector.shape_cast %114 : vector<1x1x8x4xbf16> to vector<8x4xbf16>
    %c48_216 = arith.constant 48 : index
    %c16_217 = arith.constant 16 : index
    %116 = vector.load %arg5[%c48_216, %c16_217] : memref<64x36xbf16, #tpu.memory_space<vmem>>, vector<8x4xbf16>
    tpu.vector_store %arg5[%c48_216, %c16_217], %115 {strides = array<i32>} : memref<64x36xbf16, #tpu.memory_space<vmem>>, vector<8x4xbf16>,
    %c3_218 = arith.constant 3 : index
    %c7_219 = arith.constant 7 : index
    %c0_220 = arith.constant 0 : index
    %c0_221 = arith.constant 0 : index
    %117 = vector.load %arg1[%c3_218, %c7_219, %c0_220, %c0_221] : memref<4x9x9x4xbf16, #tpu.memory_space<vmem>>, vector<1x1x8x4xbf16>
    %118 = vector.shape_cast %117 : vector<1x1x8x4xbf16> to vector<8x4xbf16>
    %c56_222 = arith.constant 56 : index
    %c16_223 = arith.constant 16 : index
    %119 = vector.load %arg5[%c56_222, %c16_223] : memref<64x36xbf16, #tpu.memory_space<vmem>>, vector<8x4xbf16>
    tpu.vector_store %arg5[%c56_222, %c16_223], %118 {strides = array<i32>} : memref<64x36xbf16, #tpu.memory_space<vmem>>, vector<8x4xbf16>,
    %c2_224 = arith.constant 2 : index
    %c0_225 = arith.constant 0 : index
    %c1_226 = arith.constant 1 : index
    %c0_227 = arith.constant 0 : index
    %120 = vector.load %arg1[%c2_224, %c0_225, %c1_226, %c0_227] : memref<4x9x9x4xbf16, #tpu.memory_space<vmem>>, vector<1x1x8x4xbf16>
    %121 = vector.shape_cast %120 : vector<1x1x8x4xbf16> to vector<8x4xbf16>
    %c0_228 = arith.constant 0 : index
    %c20 = arith.constant 20 : index
    %122 = vector.load %arg5[%c0_228, %c20] : memref<64x36xbf16, #tpu.memory_space<vmem>>, vector<8x4xbf16>
    tpu.vector_store %arg5[%c0_228, %c20], %121 {strides = array<i32>} : memref<64x36xbf16, #tpu.memory_space<vmem>>, vector<8x4xbf16>,
    %c2_229 = arith.constant 2 : index
    %c1_230 = arith.constant 1 : index
    %c1_231 = arith.constant 1 : index
    %c0_232 = arith.constant 0 : index
    %123 = vector.load %arg1[%c2_229, %c1_230, %c1_231, %c0_232] : memref<4x9x9x4xbf16, #tpu.memory_space<vmem>>, vector<1x1x8x4xbf16>
    %124 = vector.shape_cast %123 : vector<1x1x8x4xbf16> to vector<8x4xbf16>
    %c8_233 = arith.constant 8 : index
    %c20_234 = arith.constant 20 : index
    %125 = vector.load %arg5[%c8_233, %c20_234] : memref<64x36xbf16, #tpu.memory_space<vmem>>, vector<8x4xbf16>
    tpu.vector_store %arg5[%c8_233, %c20_234], %124 {strides = array<i32>} : memref<64x36xbf16, #tpu.memory_space<vmem>>, vector<8x4xbf16>,
    %c2_235 = arith.constant 2 : index
    %c2_236 = arith.constant 2 : index
    %c1_237 = arith.constant 1 : index
    %c0_238 = arith.constant 0 : index
    %126 = vector.load %arg1[%c2_235, %c2_236, %c1_237, %c0_238] : memref<4x9x9x4xbf16, #tpu.memory_space<vmem>>, vector<1x1x8x4xbf16>
    %127 = vector.shape_cast %126 : vector<1x1x8x4xbf16> to vector<8x4xbf16>
    %c16_239 = arith.constant 16 : index
    %c20_240 = arith.constant 20 : index
    %128 = vector.load %arg5[%c16_239, %c20_240] : memref<64x36xbf16, #tpu.memory_space<vmem>>, vector<8x4xbf16>
    tpu.vector_store %arg5[%c16_239, %c20_240], %127 {strides = array<i32>} : memref<64x36xbf16, #tpu.memory_space<vmem>>, vector<8x4xbf16>,
    %c2_241 = arith.constant 2 : index
    %c3_242 = arith.constant 3 : index
    %c1_243 = arith.constant 1 : index
    %c0_244 = arith.constant 0 : index
    %129 = vector.load %arg1[%c2_241, %c3_242, %c1_243, %c0_244] : memref<4x9x9x4xbf16, #tpu.memory_space<vmem>>, vector<1x1x8x4xbf16>
    %130 = vector.shape_cast %129 : vector<1x1x8x4xbf16> to vector<8x4xbf16>
    %c24_245 = arith.constant 24 : index
    %c20_246 = arith.constant 20 : index
    %131 = vector.load %arg5[%c24_245, %c20_246] : memref<64x36xbf16, #tpu.memory_space<vmem>>, vector<8x4xbf16>
    tpu.vector_store %arg5[%c24_245, %c20_246], %130 {strides = array<i32>} : memref<64x36xbf16, #tpu.memory_space<vmem>>, vector<8x4xbf16>,
    %c2_247 = arith.constant 2 : index
    %c4_248 = arith.constant 4 : index
    %c1_249 = arith.constant 1 : index
    %c0_250 = arith.constant 0 : index
    %132 = vector.load %arg1[%c2_247, %c4_248, %c1_249, %c0_250] : memref<4x9x9x4xbf16, #tpu.memory_space<vmem>>, vector<1x1x8x4xbf16>
    %133 = vector.shape_cast %132 : vector<1x1x8x4xbf16> to vector<8x4xbf16>
    %c32_251 = arith.constant 32 : index
    %c20_252 = arith.constant 20 : index
    %134 = vector.load %arg5[%c32_251, %c20_252] : memref<64x36xbf16, #tpu.memory_space<vmem>>, vector<8x4xbf16>
    tpu.vector_store %arg5[%c32_251, %c20_252], %133 {strides = array<i32>} : memref<64x36xbf16, #tpu.memory_space<vmem>>, vector<8x4xbf16>,
    %c2_253 = arith.constant 2 : index
    %c5_254 = arith.constant 5 : index
    %c1_255 = arith.constant 1 : index
    %c0_256 = arith.constant 0 : index
    %135 = vector.load %arg1[%c2_253, %c5_254, %c1_255, %c0_256] : memref<4x9x9x4xbf16, #tpu.memory_space<vmem>>, vector<1x1x8x4xbf16>
    %136 = vector.shape_cast %135 : vector<1x1x8x4xbf16> to vector<8x4xbf16>
    %c40_257 = arith.constant 40 : index
    %c20_258 = arith.constant 20 : index
    %137 = vector.load %arg5[%c40_257, %c20_258] : memref<64x36xbf16, #tpu.memory_space<vmem>>, vector<8x4xbf16>
    tpu.vector_store %arg5[%c40_257, %c20_258], %136 {strides = array<i32>} : memref<64x36xbf16, #tpu.memory_space<vmem>>, vector<8x4xbf16>,
    %c2_259 = arith.constant 2 : index
    %c6_260 = arith.constant 6 : index
    %c1_261 = arith.constant 1 : index
    %c0_262 = arith.constant 0 : index
    %138 = vector.load %arg1[%c2_259, %c6_260, %c1_261, %c0_262] : memref<4x9x9x4xbf16, #tpu.memory_space<vmem>>, vector<1x1x8x4xbf16>
    %139 = vector.shape_cast %138 : vector<1x1x8x4xbf16> to vector<8x4xbf16>
    %c48_263 = arith.constant 48 : index
    %c20_264 = arith.constant 20 : index
    %140 = vector.load %arg5[%c48_263, %c20_264] : memref<64x36xbf16, #tpu.memory_space<vmem>>, vector<8x4xbf16>
    tpu.vector_store %arg5[%c48_263, %c20_264], %139 {strides = array<i32>} : memref<64x36xbf16, #tpu.memory_space<vmem>>, vector<8x4xbf16>,
    %c2_265 = arith.constant 2 : index
    %c7_266 = arith.constant 7 : index
    %c1_267 = arith.constant 1 : index
    %c0_268 = arith.constant 0 : index
    %141 = vector.load %arg1[%c2_265, %c7_266, %c1_267, %c0_268] : memref<4x9x9x4xbf16, #tpu.memory_space<vmem>>, vector<1x1x8x4xbf16>
    %142 = vector.shape_cast %141 : vector<1x1x8x4xbf16> to vector<8x4xbf16>
    %c56_269 = arith.constant 56 : index
    %c20_270 = arith.constant 20 : index
    %143 = vector.load %arg5[%c56_269, %c20_270] : memref<64x36xbf16, #tpu.memory_space<vmem>>, vector<8x4xbf16>
    tpu.vector_store %arg5[%c56_269, %c20_270], %142 {strides = array<i32>} : memref<64x36xbf16, #tpu.memory_space<vmem>>, vector<8x4xbf16>,
    %c0_271 = arith.constant 0 : index
    %c1_272 = arith.constant 1 : index
    %c0_273 = arith.constant 0 : index
    %c0_274 = arith.constant 0 : index
    %144 = vector.load %arg1[%c0_271, %c1_272, %c0_273, %c0_274] : memref<4x9x9x4xbf16, #tpu.memory_space<vmem>>, vector<1x1x8x4xbf16>
    %145 = vector.shape_cast %144 : vector<1x1x8x4xbf16> to vector<8x4xbf16>
    %c0_275 = arith.constant 0 : index
    %c24_276 = arith.constant 24 : index
    %146 = vector.load %arg5[%c0_275, %c24_276] : memref<64x36xbf16, #tpu.memory_space<vmem>>, vector<8x4xbf16>
    tpu.vector_store %arg5[%c0_275, %c24_276], %145 {strides = array<i32>} : memref<64x36xbf16, #tpu.memory_space<vmem>>, vector<8x4xbf16>,
    %c0_277 = arith.constant 0 : index
    %c2_278 = arith.constant 2 : index
    %c0_279 = arith.constant 0 : index
    %c0_280 = arith.constant 0 : index
    %147 = vector.load %arg1[%c0_277, %c2_278, %c0_279, %c0_280] : memref<4x9x9x4xbf16, #tpu.memory_space<vmem>>, vector<1x1x8x4xbf16>
    %148 = vector.shape_cast %147 : vector<1x1x8x4xbf16> to vector<8x4xbf16>
    %c8_281 = arith.constant 8 : index
    %c24_282 = arith.constant 24 : index
    %149 = vector.load %arg5[%c8_281, %c24_282] : memref<64x36xbf16, #tpu.memory_space<vmem>>, vector<8x4xbf16>
    tpu.vector_store %arg5[%c8_281, %c24_282], %148 {strides = array<i32>} : memref<64x36xbf16, #tpu.memory_space<vmem>>, vector<8x4xbf16>,
    %c0_283 = arith.constant 0 : index
    %c3_284 = arith.constant 3 : index
    %c0_285 = arith.constant 0 : index
    %c0_286 = arith.constant 0 : index
    %150 = vector.load %arg1[%c0_283, %c3_284, %c0_285, %c0_286] : memref<4x9x9x4xbf16, #tpu.memory_space<vmem>>, vector<1x1x8x4xbf16>
    %151 = vector.shape_cast %150 : vector<1x1x8x4xbf16> to vector<8x4xbf16>
    %c16_287 = arith.constant 16 : index
    %c24_288 = arith.constant 24 : index
    %152 = vector.load %arg5[%c16_287, %c24_288] : memref<64x36xbf16, #tpu.memory_space<vmem>>, vector<8x4xbf16>
    tpu.vector_store %arg5[%c16_287, %c24_288], %151 {strides = array<i32>} : memref<64x36xbf16, #tpu.memory_space<vmem>>, vector<8x4xbf16>,
    %c0_289 = arith.constant 0 : index
    %c4_290 = arith.constant 4 : index
    %c0_291 = arith.constant 0 : index
    %c0_292 = arith.constant 0 : index
    %153 = vector.load %arg1[%c0_289, %c4_290, %c0_291, %c0_292] : memref<4x9x9x4xbf16, #tpu.memory_space<vmem>>, vector<1x1x8x4xbf16>
    %154 = vector.shape_cast %153 : vector<1x1x8x4xbf16> to vector<8x4xbf16>
    %c24_293 = arith.constant 24 : index
    %c24_294 = arith.constant 24 : index
    %155 = vector.load %arg5[%c24_293, %c24_294] : memref<64x36xbf16, #tpu.memory_space<vmem>>, vector<8x4xbf16>
    tpu.vector_store %arg5[%c24_293, %c24_294], %154 {strides = array<i32>} : memref<64x36xbf16, #tpu.memory_space<vmem>>, vector<8x4xbf16>,
    %c0_295 = arith.constant 0 : index
    %c5_296 = arith.constant 5 : index
    %c0_297 = arith.constant 0 : index
    %c0_298 = arith.constant 0 : index
    %156 = vector.load %arg1[%c0_295, %c5_296, %c0_297, %c0_298] : memref<4x9x9x4xbf16, #tpu.memory_space<vmem>>, vector<1x1x8x4xbf16>
    %157 = vector.shape_cast %156 : vector<1x1x8x4xbf16> to vector<8x4xbf16>
    %c32_299 = arith.constant 32 : index
    %c24_300 = arith.constant 24 : index
    %158 = vector.load %arg5[%c32_299, %c24_300] : memref<64x36xbf16, #tpu.memory_space<vmem>>, vector<8x4xbf16>
    tpu.vector_store %arg5[%c32_299, %c24_300], %157 {strides = array<i32>} : memref<64x36xbf16, #tpu.memory_space<vmem>>, vector<8x4xbf16>,
    %c0_301 = arith.constant 0 : index
    %c6_302 = arith.constant 6 : index
    %c0_303 = arith.constant 0 : index
    %c0_304 = arith.constant 0 : index
    %159 = vector.load %arg1[%c0_301, %c6_302, %c0_303, %c0_304] : memref<4x9x9x4xbf16, #tpu.memory_space<vmem>>, vector<1x1x8x4xbf16>
    %160 = vector.shape_cast %159 : vector<1x1x8x4xbf16> to vector<8x4xbf16>
    %c40_305 = arith.constant 40 : index
    %c24_306 = arith.constant 24 : index
    %161 = vector.load %arg5[%c40_305, %c24_306] : memref<64x36xbf16, #tpu.memory_space<vmem>>, vector<8x4xbf16>
    tpu.vector_store %arg5[%c40_305, %c24_306], %160 {strides = array<i32>} : memref<64x36xbf16, #tpu.memory_space<vmem>>, vector<8x4xbf16>,
    %c0_307 = arith.constant 0 : index
    %c7_308 = arith.constant 7 : index
    %c0_309 = arith.constant 0 : index
    %c0_310 = arith.constant 0 : index
    %162 = vector.load %arg1[%c0_307, %c7_308, %c0_309, %c0_310] : memref<4x9x9x4xbf16, #tpu.memory_space<vmem>>, vector<1x1x8x4xbf16>
    %163 = vector.shape_cast %162 : vector<1x1x8x4xbf16> to vector<8x4xbf16>
    %c48_311 = arith.constant 48 : index
    %c24_312 = arith.constant 24 : index
    %164 = vector.load %arg5[%c48_311, %c24_312] : memref<64x36xbf16, #tpu.memory_space<vmem>>, vector<8x4xbf16>
    tpu.vector_store %arg5[%c48_311, %c24_312], %163 {strides = array<i32>} : memref<64x36xbf16, #tpu.memory_space<vmem>>, vector<8x4xbf16>,
    %c0_313 = arith.constant 0 : index
    %c8_314 = arith.constant 8 : index
    %c0_315 = arith.constant 0 : index
    %c0_316 = arith.constant 0 : index
    %165 = vector.load %arg1[%c0_313, %c8_314, %c0_315, %c0_316] : memref<4x9x9x4xbf16, #tpu.memory_space<vmem>>, vector<1x1x8x4xbf16>
    %166 = vector.shape_cast %165 : vector<1x1x8x4xbf16> to vector<8x4xbf16>
    %c56_317 = arith.constant 56 : index
    %c24_318 = arith.constant 24 : index
    %167 = vector.load %arg5[%c56_317, %c24_318] : memref<64x36xbf16, #tpu.memory_space<vmem>>, vector<8x4xbf16>
    tpu.vector_store %arg5[%c56_317, %c24_318], %166 {strides = array<i32>} : memref<64x36xbf16, #tpu.memory_space<vmem>>, vector<8x4xbf16>,
    %c1_319 = arith.constant 1 : index
    %c1_320 = arith.constant 1 : index
    %c0_321 = arith.constant 0 : index
    %c0_322 = arith.constant 0 : index
    %168 = vector.load %arg1[%c1_319, %c1_320, %c0_321, %c0_322] : memref<4x9x9x4xbf16, #tpu.memory_space<vmem>>, vector<1x1x8x4xbf16>
    %169 = vector.shape_cast %168 : vector<1x1x8x4xbf16> to vector<8x4xbf16>
    %c0_323 = arith.constant 0 : index
    %c28 = arith.constant 28 : index
    %170 = vector.load %arg5[%c0_323, %c28] : memref<64x36xbf16, #tpu.memory_space<vmem>>, vector<8x4xbf16>
    tpu.vector_store %arg5[%c0_323, %c28], %169 {strides = array<i32>} : memref<64x36xbf16, #tpu.memory_space<vmem>>, vector<8x4xbf16>,
    %c1_324 = arith.constant 1 : index
    %c2_325 = arith.constant 2 : index
    %c0_326 = arith.constant 0 : index
    %c0_327 = arith.constant 0 : index
    %171 = vector.load %arg1[%c1_324, %c2_325, %c0_326, %c0_327] : memref<4x9x9x4xbf16, #tpu.memory_space<vmem>>, vector<1x1x8x4xbf16>
    %172 = vector.shape_cast %171 : vector<1x1x8x4xbf16> to vector<8x4xbf16>
    %c8_328 = arith.constant 8 : index
    %c28_329 = arith.constant 28 : index
    %173 = vector.load %arg5[%c8_328, %c28_329] : memref<64x36xbf16, #tpu.memory_space<vmem>>, vector<8x4xbf16>
    tpu.vector_store %arg5[%c8_328, %c28_329], %172 {strides = array<i32>} : memref<64x36xbf16, #tpu.memory_space<vmem>>, vector<8x4xbf16>,
    %c1_330 = arith.constant 1 : index
    %c3_331 = arith.constant 3 : index
    %c0_332 = arith.constant 0 : index
    %c0_333 = arith.constant 0 : index
    %174 = vector.load %arg1[%c1_330, %c3_331, %c0_332, %c0_333] : memref<4x9x9x4xbf16, #tpu.memory_space<vmem>>, vector<1x1x8x4xbf16>
    %175 = vector.shape_cast %174 : vector<1x1x8x4xbf16> to vector<8x4xbf16>
    %c16_334 = arith.constant 16 : index
    %c28_335 = arith.constant 28 : index
    %176 = vector.load %arg5[%c16_334, %c28_335] : memref<64x36xbf16, #tpu.memory_space<vmem>>, vector<8x4xbf16>
    tpu.vector_store %arg5[%c16_334, %c28_335], %175 {strides = array<i32>} : memref<64x36xbf16, #tpu.memory_space<vmem>>, vector<8x4xbf16>,
    %c1_336 = arith.constant 1 : index
    %c4_337 = arith.constant 4 : index
    %c0_338 = arith.constant 0 : index
    %c0_339 = arith.constant 0 : index
    %177 = vector.load %arg1[%c1_336, %c4_337, %c0_338, %c0_339] : memref<4x9x9x4xbf16, #tpu.memory_space<vmem>>, vector<1x1x8x4xbf16>
    %178 = vector.shape_cast %177 : vector<1x1x8x4xbf16> to vector<8x4xbf16>
    %c24_340 = arith.constant 24 : index
    %c28_341 = arith.constant 28 : index
    %179 = vector.load %arg5[%c24_340, %c28_341] : memref<64x36xbf16, #tpu.memory_space<vmem>>, vector<8x4xbf16>
    tpu.vector_store %arg5[%c24_340, %c28_341], %178 {strides = array<i32>} : memref<64x36xbf16, #tpu.memory_space<vmem>>, vector<8x4xbf16>,
    %c1_342 = arith.constant 1 : index
    %c5_343 = arith.constant 5 : index
    %c0_344 = arith.constant 0 : index
    %c0_345 = arith.constant 0 : index
    %180 = vector.load %arg1[%c1_342, %c5_343, %c0_344, %c0_345] : memref<4x9x9x4xbf16, #tpu.memory_space<vmem>>, vector<1x1x8x4xbf16>
    %181 = vector.shape_cast %180 : vector<1x1x8x4xbf16> to vector<8x4xbf16>
    %c32_346 = arith.constant 32 : index
    %c28_347 = arith.constant 28 : index
    %182 = vector.load %arg5[%c32_346, %c28_347] : memref<64x36xbf16, #tpu.memory_space<vmem>>, vector<8x4xbf16>
    tpu.vector_store %arg5[%c32_346, %c28_347], %181 {strides = array<i32>} : memref<64x36xbf16, #tpu.memory_space<vmem>>, vector<8x4xbf16>,
    %c1_348 = arith.constant 1 : index
    %c6_349 = arith.constant 6 : index
    %c0_350 = arith.constant 0 : index
    %c0_351 = arith.constant 0 : index
    %183 = vector.load %arg1[%c1_348, %c6_349, %c0_350, %c0_351] : memref<4x9x9x4xbf16, #tpu.memory_space<vmem>>, vector<1x1x8x4xbf16>
    %184 = vector.shape_cast %183 : vector<1x1x8x4xbf16> to vector<8x4xbf16>
    %c40_352 = arith.constant 40 : index
    %c28_353 = arith.constant 28 : index
    %185 = vector.load %arg5[%c40_352, %c28_353] : memref<64x36xbf16, #tpu.memory_space<vmem>>, vector<8x4xbf16>
    tpu.vector_store %arg5[%c40_352, %c28_353], %184 {strides = array<i32>} : memref<64x36xbf16, #tpu.memory_space<vmem>>, vector<8x4xbf16>,
    %c1_354 = arith.constant 1 : index
    %c7_355 = arith.constant 7 : index
    %c0_356 = arith.constant 0 : index
    %c0_357 = arith.constant 0 : index
    %186 = vector.load %arg1[%c1_354, %c7_355, %c0_356, %c0_357] : memref<4x9x9x4xbf16, #tpu.memory_space<vmem>>, vector<1x1x8x4xbf16>
    %187 = vector.shape_cast %186 : vector<1x1x8x4xbf16> to vector<8x4xbf16>
    %c48_358 = arith.constant 48 : index
    %c28_359 = arith.constant 28 : index
    %188 = vector.load %arg5[%c48_358, %c28_359] : memref<64x36xbf16, #tpu.memory_space<vmem>>, vector<8x4xbf16>
    tpu.vector_store %arg5[%c48_358, %c28_359], %187 {strides = array<i32>} : memref<64x36xbf16, #tpu.memory_space<vmem>>, vector<8x4xbf16>,
    %c1_360 = arith.constant 1 : index
    %c8_361 = arith.constant 8 : index
    %c0_362 = arith.constant 0 : index
    %c0_363 = arith.constant 0 : index
    %189 = vector.load %arg1[%c1_360, %c8_361, %c0_362, %c0_363] : memref<4x9x9x4xbf16, #tpu.memory_space<vmem>>, vector<1x1x8x4xbf16>
    %190 = vector.shape_cast %189 : vector<1x1x8x4xbf16> to vector<8x4xbf16>
    %c56_364 = arith.constant 56 : index
    %c28_365 = arith.constant 28 : index
    %191 = vector.load %arg5[%c56_364, %c28_365] : memref<64x36xbf16, #tpu.memory_space<vmem>>, vector<8x4xbf16>
    tpu.vector_store %arg5[%c56_364, %c28_365], %190 {strides = array<i32>} : memref<64x36xbf16, #tpu.memory_space<vmem>>, vector<8x4xbf16>,
    %c0_366 = arith.constant 0 : index
    %c1_367 = arith.constant 1 : index
    %c1_368 = arith.constant 1 : index
    %c0_369 = arith.constant 0 : index
    %192 = vector.load %arg1[%c0_366, %c1_367, %c1_368, %c0_369] : memref<4x9x9x4xbf16, #tpu.memory_space<vmem>>, vector<1x1x8x4xbf16>
    %193 = vector.shape_cast %192 : vector<1x1x8x4xbf16> to vector<8x4xbf16>
    %c0_370 = arith.constant 0 : index
    %c32_371 = arith.constant 32 : index
    %194 = vector.load %arg5[%c0_370, %c32_371] : memref<64x36xbf16, #tpu.memory_space<vmem>>, vector<8x4xbf16>
    tpu.vector_store %arg5[%c0_370, %c32_371], %193 {strides = array<i32>} : memref<64x36xbf16, #tpu.memory_space<vmem>>, vector<8x4xbf16>,
    %c0_372 = arith.constant 0 : index
    %c2_373 = arith.constant 2 : index
    %c1_374 = arith.constant 1 : index
    %c0_375 = arith.constant 0 : index
    %195 = vector.load %arg1[%c0_372, %c2_373, %c1_374, %c0_375] : memref<4x9x9x4xbf16, #tpu.memory_space<vmem>>, vector<1x1x8x4xbf16>
    %196 = vector.shape_cast %195 : vector<1x1x8x4xbf16> to vector<8x4xbf16>
    %c8_376 = arith.constant 8 : index
    %c32_377 = arith.constant 32 : index
    %197 = vector.load %arg5[%c8_376, %c32_377] : memref<64x36xbf16, #tpu.memory_space<vmem>>, vector<8x4xbf16>
    tpu.vector_store %arg5[%c8_376, %c32_377], %196 {strides = array<i32>} : memref<64x36xbf16, #tpu.memory_space<vmem>>, vector<8x4xbf16>,
    %c0_378 = arith.constant 0 : index
    %c3_379 = arith.constant 3 : index
    %c1_380 = arith.constant 1 : index
    %c0_381 = arith.constant 0 : index
    %198 = vector.load %arg1[%c0_378, %c3_379, %c1_380, %c0_381] : memref<4x9x9x4xbf16, #tpu.memory_space<vmem>>, vector<1x1x8x4xbf16>
    %199 = vector.shape_cast %198 : vector<1x1x8x4xbf16> to vector<8x4xbf16>
    %c16_382 = arith.constant 16 : index
    %c32_383 = arith.constant 32 : index
    %200 = vector.load %arg5[%c16_382, %c32_383] : memref<64x36xbf16, #tpu.memory_space<vmem>>, vector<8x4xbf16>
    tpu.vector_store %arg5[%c16_382, %c32_383], %199 {strides = array<i32>} : memref<64x36xbf16, #tpu.memory_space<vmem>>, vector<8x4xbf16>,
    %c0_384 = arith.constant 0 : index
    %c4_385 = arith.constant 4 : index
    %c1_386 = arith.constant 1 : index
    %c0_387 = arith.constant 0 : index
    %201 = vector.load %arg1[%c0_384, %c4_385, %c1_386, %c0_387] : memref<4x9x9x4xbf16, #tpu.memory_space<vmem>>, vector<1x1x8x4xbf16>
    %202 = vector.shape_cast %201 : vector<1x1x8x4xbf16> to vector<8x4xbf16>
    %c24_388 = arith.constant 24 : index
    %c32_389 = arith.constant 32 : index
    %203 = vector.load %arg5[%c24_388, %c32_389] : memref<64x36xbf16, #tpu.memory_space<vmem>>, vector<8x4xbf16>
    tpu.vector_store %arg5[%c24_388, %c32_389], %202 {strides = array<i32>} : memref<64x36xbf16, #tpu.memory_space<vmem>>, vector<8x4xbf16>,
    %c0_390 = arith.constant 0 : index
    %c5_391 = arith.constant 5 : index
    %c1_392 = arith.constant 1 : index
    %c0_393 = arith.constant 0 : index
    %204 = vector.load %arg1[%c0_390, %c5_391, %c1_392, %c0_393] : memref<4x9x9x4xbf16, #tpu.memory_space<vmem>>, vector<1x1x8x4xbf16>
    %205 = vector.shape_cast %204 : vector<1x1x8x4xbf16> to vector<8x4xbf16>
    %c32_394 = arith.constant 32 : index
    %c32_395 = arith.constant 32 : index
    %206 = vector.load %arg5[%c32_394, %c32_395] : memref<64x36xbf16, #tpu.memory_space<vmem>>, vector<8x4xbf16>
    tpu.vector_store %arg5[%c32_394, %c32_395], %205 {strides = array<i32>} : memref<64x36xbf16, #tpu.memory_space<vmem>>, vector<8x4xbf16>,
    %c0_396 = arith.constant 0 : index
    %c6_397 = arith.constant 6 : index
    %c1_398 = arith.constant 1 : index
    %c0_399 = arith.constant 0 : index
    %207 = vector.load %arg1[%c0_396, %c6_397, %c1_398, %c0_399] : memref<4x9x9x4xbf16, #tpu.memory_space<vmem>>, vector<1x1x8x4xbf16>
    %208 = vector.shape_cast %207 : vector<1x1x8x4xbf16> to vector<8x4xbf16>
    %c40_400 = arith.constant 40 : index
    %c32_401 = arith.constant 32 : index
    %209 = vector.load %arg5[%c40_400, %c32_401] : memref<64x36xbf16, #tpu.memory_space<vmem>>, vector<8x4xbf16>
    tpu.vector_store %arg5[%c40_400, %c32_401], %208 {strides = array<i32>} : memref<64x36xbf16, #tpu.memory_space<vmem>>, vector<8x4xbf16>,
    %c0_402 = arith.constant 0 : index
    %c7_403 = arith.constant 7 : index
    %c1_404 = arith.constant 1 : index
    %c0_405 = arith.constant 0 : index
    %210 = vector.load %arg1[%c0_402, %c7_403, %c1_404, %c0_405] : memref<4x9x9x4xbf16, #tpu.memory_space<vmem>>, vector<1x1x8x4xbf16>
    %211 = vector.shape_cast %210 : vector<1x1x8x4xbf16> to vector<8x4xbf16>
    %c48_406 = arith.constant 48 : index
    %c32_407 = arith.constant 32 : index
    %212 = vector.load %arg5[%c48_406, %c32_407] : memref<64x36xbf16, #tpu.memory_space<vmem>>, vector<8x4xbf16>
    tpu.vector_store %arg5[%c48_406, %c32_407], %211 {strides = array<i32>} : memref<64x36xbf16, #tpu.memory_space<vmem>>, vector<8x4xbf16>,
    %c0_408 = arith.constant 0 : index
    %c8_409 = arith.constant 8 : index
    %c1_410 = arith.constant 1 : index
    %c0_411 = arith.constant 0 : index
    %213 = vector.load %arg1[%c0_408, %c8_409, %c1_410, %c0_411] : memref<4x9x9x4xbf16, #tpu.memory_space<vmem>>, vector<1x1x8x4xbf16>
    %214 = vector.shape_cast %213 : vector<1x1x8x4xbf16> to vector<8x4xbf16>
    %c56_412 = arith.constant 56 : index
    %c32_413 = arith.constant 32 : index
    %215 = vector.load %arg5[%c56_412, %c32_413] : memref<64x36xbf16, #tpu.memory_space<vmem>>, vector<8x4xbf16>
    tpu.vector_store %arg5[%c56_412, %c32_413], %214 {strides = array<i32>} : memref<64x36xbf16, #tpu.memory_space<vmem>>, vector<8x4xbf16>,
    %c0_414 = arith.constant 0 : index
    %c0_415 = arith.constant 0 : index
    %216 = vector.load %arg2[%c0_414, %c0_415] : memref<36x128xbf16, #tpu.memory_space<vmem>>, vector<36x128xbf16>
    %c0_416 = arith.constant 0 : index
    %c0_417 = arith.constant 0 : index
    %217 = vector.load %arg3[%c0_416, %c0_417] : memref<1x128xf32, #tpu.memory_space<vmem>>, vector<1x128xf32>
    %c0_418 = arith.constant 0 : index
    %c0_419 = arith.constant 0 : index
    %218 = vector.load %arg5[%c0_418, %c0_419] : memref<64x36xbf16, #tpu.memory_space<vmem>>, vector<64x36xbf16>
    %cst = arith.constant dense<0.000000e+00> : vector<64x128xf32>
    %219 = tpu.matmul %218, %216, %cst {dimension_numbers = #tpu.dot_dimension_numbers<[1], [0], [0], [1], [0, 0, 1, 1], [], []>} : vector<64x36xbf16>, vector<36x128xbf16>, vector<64x128xf32> -> vector<64x128xf32>
    %220 = vector.broadcast %217 : vector<1x128xf32> to vector<64x128xf32>
    %221 = arith.addf %219, %220 : vector<64x128xf32>
    %cst_420 = arith.constant 0.000000e+00 : f32
    %222 = vector.broadcast %cst_420 : f32 to vector<64x128xf32>
    %223 = arith.maximumf %221, %222 : vector<64x128xf32>
    %c0_421 = arith.constant 0 : index
    %c0_422 = arith.constant 0 : index
    %c0_423 = arith.constant 0 : index
    %224 = vector.load %arg4[%c0_421, %c0_422, %c0_423] : memref<1x64x128xf32, #tpu.memory_space<vmem>>, vector<1x64x128xf32>
    %225 = vector.shape_cast %224 : vector<1x64x128xf32> to vector<64x128xf32>
    %226 = vector.shape_cast %223 : vector<64x128xf32> to vector<1x64x128xf32>
    tpu.vector_store %arg4[%c0_421, %c0_422, %c0_423], %226 {strides = array<i32>} : memref<1x64x128xf32, #tpu.memory_space<vmem>>, vector<1x64x128xf32>,
    return
  }
  func.func @transform_0(%arg0: i32) -> (i32, i32, i32, i32) {
    %c0_i32 = arith.constant 0 : i32
    %c0_i32_0 = arith.constant 0 : i32
    %c0_i32_1 = arith.constant 0 : i32
    %c0_i32_2 = arith.constant 0 : i32
    return %arg0, %c0_i32, %c0_i32_0, %c0_i32_1 : i32, i32, i32, i32
  }
  func.func @transform_1(%arg0: i32) -> (i32, i32) {
    %c0_i32 = arith.constant 0 : i32
    %c0_i32_0 = arith.constant 0 : i32
    %c0_i32_1 = arith.constant 0 : i32
    return %c0_i32, %c0_i32_0 : i32, i32
  }
  func.func @transform_2(%arg0: i32) -> (i32, i32) {
    %c0_i32 = arith.constant 0 : i32
    %c0_i32_0 = arith.constant 0 : i32
    %c0_i32_1 = arith.constant 0 : i32
    return %c0_i32, %c0_i32_0 : i32, i32
  }
  func.func @transform_3(%arg0: i32) -> (i32, i32, i32) {
    %c0_i32 = arith.constant 0 : i32
    %c0_i32_0 = arith.constant 0 : i32
    %c0_i32_1 = arith.constant 0 : i32
    return %arg0, %c0_i32, %c0_i32_0 : i32, i32, i32
  }
}

</mosaic_0001>

<bundles_post_ra>
// kernel: tpu_custom_call.1
= control target key start
LH: loop header
LB: loop body
LE: loop exit
PB: predicated region body
PF: predicated region fallthrough
CT: control target
= control target key end

     0   :  { %8 = vsyncpa [#allocation4], 0  ;;  %s1948_s0 = inlined_call_operand.vmem [shape: bf16[8,9,9,4], index: 0, kind: input, shape index: {}]   ;;  %s1949_s1 = inlined_call_operand.vmem [shape: bf16[36,128], index: 1, kind: input, shape index: {}]   ;;  %s1950_s2 = inlined_call_operand.vmem [shape: f32[1,128], index: 2, kind: input, shape index: {}]   ;;  %s1951_s3 = inlined_call_operand.hbm [shape: f32[2,64,128], index: 3, kind: output, shape index: {}]  }
   0x1   :  { %10 = vsyncpa [#allocation4 + $0x1], 0  ;;  %s1652_s12 = smov 0   ;;  %s1654_s13 = smov 0  }
   0x2   :  { %s1656_s14 = smov 0   ;;  %s1658_s15 = smov 0  }
   0x3 LB: > { %s1673_s16 = sadd.s32 4294967295, %s1620_s15   ;;  %s1227_s17 = sadd.s32 4294967294, %s1620_s15   ;;  %s1620_s15 = sphi %s1658_s15, %s1957_s15   ;;  %s1616_s14 = sphi %s1656_s14, %s1956_s14   ;;  %s1612_s13 = sphi %s1654_s13, %s1955_s13   ;;  %s1608_s12 = sphi %s1652_s12, %s1954_s12  }
   0x4   : > { %s1677_s18 = sadd.s32 1, %s1620_s15   ;;  %s91_s19 = sadd.s32 1, %s1616_s14 }
   0x5   : > { %s88_s20 = ssub.s32 %s1620_s15, %s1677_s18  ;;  %p101_p0 = scmp.ne.s32.totalorder %s1616_s14, %s1612_s13 }
   0x6   : > { %p89_p1 = scmp.eq.s32.totalorder %s88_s20, 0  ;;  %p102_p2 = scmp.eq.s32.totalorder %s1673_s16, 1 }
   0x7   : > { %p107_p3 = scmp.ne.s32.totalorder %s1612_s13, %s1608_s12  ;;  %p108_p4 = scmp.eq.s32.totalorder %s1227_s17, 1 }
   0x8   : > { %s1688_s21 = scalar_select %p89_p1, %s1616_s14, %s91_s19  }
   0x9   : > { %p1690_p5 = por %p102_p2, %p101_p0  ;;  %p1694_p6 = por %p108_p4, %p107_p3 }
   0xa   : > { %p1230_p7 = scmp.ge.s32.totalorder %s1620_s15, 1  ;;  %p142_p8 = scmp.lt.s32.totalorder %s1620_s15, 3 }
   0xc   : > { %p143_p9 = pnand %p1230_p7, %p142_p8 }
   0xd   : > { %s1232_s24 = sshll.u32 (!%p143_p9), %s1673_s16, 2  ;;  %s1622_s29 = smov (!%p143_p9), 4   ;;  %vm176_vm0 = vcmask (!%p143_p9), 27648   ;;  %vm184_vm1 = vcmask (!%p143_p9), 31748   ;;  %vm224_vm2 = vcmask (!%p143_p9), 60448   ;;  %vm1066_vm3 = vcmask (!%p143_p9), 1041408  }
   0xe   : > { %146 = sbr.rel (%p143_p9) target bundleno = 508 (0x1fc), region = 32  ;;  %p168_p10 = scmp.lt.s32.totalorder (!%p143_p9), %s1232_s24, 7  ;;  %vm234_vm4 = vcmask (!%p143_p9), 64548   ;;  %vm327_vm5 = vcmask (!%p143_p9), 97348   ;;  %vm307_vm6 = vcmask (!%p143_p9), 93248   ;;  %vm458_vm7 = vcmask (!%p143_p9), 130148  }
   0xf   : > { %s1623_s30 = smov (!%p143_p9), 8   ;;  %s1624_s4 = smov (!%p143_p9), 12   ;;  %vm448_vm8 = vcmask (!%p143_p9), 126048   ;;  %vm532_vm9 = vcmask (!%p143_p9), 162948   ;;  %vm522_vm10 = vcmask (!%p143_p9), 158848   ;;  %vm625_vm11 = vcmask (!%p143_p9), 195748  }
  0x10   : > { %s1625_s5 = smov (!%p143_p9), 16   ;;  %s1626_s6 = smov (!%p143_p9), 20   ;;  %vm605_vm12 = vcmask (!%p143_p9), 191648   ;;  %vm754_vm13 = vcmask (!%p143_p9), 228548   ;;  %vm745_vm14 = vcmask (!%p143_p9), 224448   ;;  %vm821_vm15 = vcmask (!%p143_p9), 261348  }
  0x11   : > { %s1627_s7 = smov (!%p143_p9), 24   ;;  %s1628_s8 = smov (!%p143_p9), 28  }
  0x12   : > { %s1630_s10 = smov (!%p143_p9), [#allocation3]  }
  0x13   : > { %s1562_s11 = sshll.u32 (!%p143_p9), %s1630_s10, 4  ;;  %s1563_s11 = int_to_ptr.vmem [resolvable:$false] %s1562_s11 }
  0x14   : > { %s1564_s17 = scalar_lea.vmem (!%p143_p9), %s1563_s11, 2048 }
  0x15   : > { %s1959_s24 = smov (!%p168_p10, %s1232_s24), 7 }
  0x16   : > { %s1438_s25 = smul.u32 72, %s1959_s24  ;;  %s1629_s24 = smov 32  }
  0x18   : > { %s1704_s28 = scalar_lea.vmem %s1948_s0, %s1438_s25  ;;  %s164_s25 = sand.u32 1, %s1612_s13  }
  0x19   : > { %v1487_v0 = vld [vmem:[%s1704_s28 + $0x68] ss:$0 sps:$4 sm:$0xff]   ;;  %v1489_v2 = vld [vmem:[%s1704_s28 + $0x70] ss:$0 sps:$4 sm:$0xff]   ;;  %v1491_v4 = vld [vmem:[%s1704_s28 + $0x60] ss:$0 sps:$4 sm:$0xff]  }
  0x1a   : > { %v1488_v1 = vld [vmem:[%s1704_s28 + $0x48] ss:$0 sps:$4 sm:$0xff]   ;;  %259 = vrot.lane.b32.xlu1 %v1487_v0, %s1622_s29  ;;  %v1490_v3 = vld [vmem:[%s1704_s28 + $0x50] ss:$0 sps:$4 sm:$0xff]   ;;  %v1492_v5 = vld [vmem:[%s1704_s28 + $0x58] ss:$0 sps:$4 sm:$0xff]  }
  0x1b   : > { %221 = vrot.lane.b32.xlu0 %v1488_v1, %s1622_s29  ;;  %v1495_v6 = vld [vmem:[%s1704_s28 + $0x8] sm:$0x1f]   ;;  %v1496_v7 = vld [vmem:[%s1704_s28] sm:$0x1f]   ;;  %v1494_v12 = vld [vmem:[%s1704_s28 + $0x78] ss:$0 sps:$4 sm:$0xff]  }
  0x1c   : > { %v1493_v8 = vld [vmem:[%s1704_s28 + $0x80] ss:$0 sps:$4 sm:$0xff]   ;;  %v317_v9 = vshrl.u32 %v1495_v6, 16  ;;  %v320_v10 = vshll.u32 %v1495_v6, 16  ;;  %v1497_v11 = vld [vmem:[%s1704_s28 + $0x28] sm:$0x1f]  }
  0x1d   : > { %v300_v13 = vshll.u32 %v1496_v7, 16  ;;  %v1498_v14 = vld [vmem:[%s1704_s28 + $0x20] sm:$0x1f]   ;;  %v392_v17 = vshrl.u32 %v1497_v11, 16  ;;  %v395_v18 = vshll.u32 %v1497_v11, 16  ;;  %v298_v19 = vshrl.u32 %v1496_v7, 16 }
  0x1e   : > { %268 = vrot.lane.b32.xlu1 %v1489_v2, %s1622_s29  ;;  %v319_v15 = vrot.slane %v317_v9, 4  ;;  %v322_v16 = vrot.slane %v320_v10, 5  ;;  %v376_v21 = vshll.u32 %v1498_v14, 16  ;;  %v374_v22 = vshrl.u32 %v1498_v14, 16  ;;  %v1499_v23 = vld [vmem:[%s1704_s28 + $0x18] sm:$0x1f]  }
  0x1f   : > { %231 = vrot.lane.b32.xlu0 %v1490_v3, %s1622_s29  ;;  %v302_v20 = vrot.slane %v300_v13, 1  ;;  %v394_v24 = vrot.slane %v392_v17, 4  ;;  %v397_v25 = vrot.slane %v395_v18, 5  ;;  %v1500_v26 = vld [vmem:[%s1704_s28 + $0x10] sm:$0x1f]   ;;  %v355_v28 = vshrl.u32 %v1499_v23, 16 }
  0x20   : > { %v323_v27 = vor.u32 %v322_v16, %v319_v15  ;;  %v358_v29 = vshll.u32 %v1499_v23, 16  ;;  %v378_v31 = vrot.slane %v376_v21, 1  ;;  %v339_v32 = vshll.u32 %v1500_v26, 16  ;;  %v1501_v33 = vld [vmem:[%s1704_s28 + $0x38] sm:$0x1f]  }
  0x21   : > { %v303_v30 = vor.u32 %v302_v20, %v298_v19  ;;  %v1502_v34 = vld [vmem:[%s1704_s28 + $0x30] sm:$0x1f]   ;;  %v398_v35 = vor.u32 %v397_v25, %v394_v24  ;;  %v357_v36 = vrot.slane %v355_v28, 4  ;;  %v429_v38 = vshrl.u32 %v1501_v33, 16  ;;  %v1503_v52 = vld [vmem:[%s1704_s28 + $0x98] ss:$0 sps:$4 sm:$0xff]  }
  0x22   : > { %250 = vrot.lane.b32.xlu1 %v1491_v4, %s1622_s29  ;;  %v360_v37 = vrot.slane %v358_v29, 5  ;;  %v432_v39 = vshll.u32 %v1501_v33, 16  ;;  %v379_v40 = vor.u32 %v378_v31, %v374_v22  ;;  %v337_v41 = vshrl.u32 %v1500_v26, 16  ;;  %v1504_v53 = vld [vmem:[%s1704_s28 + $0x90] ss:$0 sps:$4 sm:$0xff]  }
  0x23   : > { %241 = vrot.lane.b32.xlu0 %v1492_v5, %s1622_s29  ;;  %v341_v42 = vrot.slane %v339_v32, 1  ;;  %v413_v43 = vshll.u32 %v1502_v34, 16  ;;  %v431_v45 = vrot.slane %v429_v38, 4  ;;  %v411_v48 = vshrl.u32 %v1502_v34, 16  ;;  %v1505_v54 = vld [vmem:[%s1704_s28 + $0xb8] ss:$0 sps:$4 sm:$0xff]  }
  0x24   : > { %v361_v44 = vor.u32 %v360_v37, %v357_v36  ;;  %v434_v46 = vrot.slane %v432_v39, 5  ;;  %v1506_v55 = vld [vmem:[%s1704_s28 + $0xb0] ss:$0 sps:$4 sm:$0xff]   ;;  %v1507_v56 = vld [vmem:[%s1704_s28 + $0xa8] ss:$0 sps:$4 sm:$0xff]  }
  0x25   : > { %v342_v47 = vor.u32 %v341_v42, %v337_v41  ;;  %v415_v49 = vrot.slane %v413_v43, 1  ;;  %v1508_v57 = vld [vmem:[%s1704_s28 + $0xa0] ss:$0 sps:$4 sm:$0xff]   ;;  %v1509_v58 = vld [vmem:[%s1704_s28 + $0xc8] ss:$0 sps:$4 sm:$0xff]  }
  0x26   : > { %286 = vrot.lane.b32.xlu1 %v1493_v8, %s1622_s29  ;;  %v435_v50 = vor.u32 %v434_v46, %v431_v45  ;;  %v1510_v59 = vld [vmem:[%s1704_s28 + $0xc0] ss:$0 sps:$4 sm:$0xff]   ;;  %v1512_v61 = vld [vmem:[%s1704_s28 + $0xd8] ss:$0 sps:$4 sm:$0xff]   ;;  %v1520_v1 = vld [vmem:[%s1704_s28 + $0x90] sm:$0x1f]  }
  0x27   : > { %277 = vrot.lane.b32.xlu0 %v1494_v12, %s1622_s29  ;;  %v416_v51 = vor.u32 %v415_v49, %v411_v48  ;;  %v1511_v60 = vld [vmem:[%s1704_s28 + $0xe0] ss:$0 sps:$4 sm:$0xff]   ;;  %v1519_v63 = vld [vmem:[%s1704_s28 + $0x98] sm:$0x1f]   ;;  %v1515_v2 = vld [vmem:[%s1704_s28 + $0xf0] ss:$0 sps:$4 sm:$0xff]  }
  0x28   : > { %v1513_v62 = vld [vmem:[%s1704_s28 + $0x100] ss:$0 sps:$4 sm:$0xff]   ;;  %v1514_v0 = vld [vmem:[%s1704_s28 + $0xf8] ss:$0 sps:$4 sm:$0xff]   ;;  %v1516_v4 = vld [vmem:[%s1704_s28 + $0xe8] ss:$0 sps:$4 sm:$0xff]  }
  0x29   : > { %v1521_v3 = vld [vmem:[%s1704_s28 + $0xb8] sm:$0x1f]   ;;  %v1522_v5 = vld [vmem:[%s1704_s28 + $0xb0] sm:$0x1f]   ;;  %v615_v6 = vshrl.u32 %v1519_v63, 16  ;;  %v618_v7 = vshll.u32 %v1519_v63, 16 }
  0x2a   : > { %324 = vrot.lane.b32.xlu1 %v323_v27, %s1623_s30  ;;  %v598_v8 = vshll.u32 %v1520_v1, 16  ;;  %v1239_v9 = vld [vmem:[%s1704_s28 + $0x20] sm:$0xf]  ;;  %v1517_v11 = vld [vmem:[%s1704_s28 + $0x110] ss:$0 sps:$4 sm:$0xff]   ;;  %v690_v12 = vshrl.u32 %v1521_v3, 16 }
  0x2b   : > { %304 = vrot.lane.b32.xlu0 %v303_v30, %s1623_s30  ;;  %v175_v10 = vld [vmem:[%s1704_s28] sm:$0xf]  ;;  %v693_v13 = vshll.u32 %v1521_v3, 16  ;;  %198 = vst.msk [vmem:[#allocation2 + $0x10] sm:$0xf] %vm176_vm0, %v1239_v9  ;;  %v674_v15 = vshll.u32 %v1522_v5, 16 }
  0x2c   : > { %177 = vst.msk [vmem:[#allocation2] sm:$0xf] %vm176_vm0, %v175_v10  ;;  %v1518_v14 = vld [vmem:[%s1704_s28 + $0x108] ss:$0 sps:$4 sm:$0xff]   ;;  %v617_v17 = vrot.slane %v615_v6, 4  ;;  %v620_v18 = vrot.slane %v618_v7, 5 }
  0x2d   : > { %v1523_v16 = vld [vmem:[%s1704_s28 + $0xa8] sm:$0x1f]   ;;  %v1524_v19 = vld [vmem:[%s1704_s28 + $0xa0] sm:$0x1f]   ;;  %v596_v20 = vshrl.u32 %v1520_v1, 16  ;;  %v600_v21 = vrot.slane %v598_v8, 1 }
  0x2e   : > { %399 = vrot.lane.b32.xlu1 %v398_v35, %s1623_s30  ;;  %v672_v22 = vshrl.u32 %v1522_v5, 16  ;;  %v692_v23 = vrot.slane %v690_v12, 4  ;;  %v695_v24 = vrot.slane %v693_v13, 5  ;;  %v1547_v25 = vld [vmem:[%s1704_s28 + $0x28] ss:$0 sps:$4 sm:$0xff]   ;;  %v676_v26 = vrot.slane %v674_v15, 1 }
  0x2f   : > { %380 = vrot.lane.b32.xlu0 %v379_v40, %s1623_s30  ;;  %v653_v27 = vshrl.u32 %v1523_v16, 16  ;;  %v1548_v28 = vld [vmem:[%s1704_s28 + $0x8] ss:$0 sps:$4 sm:$0xff]   ;;  %v621_v29 = vor.u32 %v620_v18, %v617_v17  ;;  %v656_v30 = vshll.u32 %v1523_v16, 16  ;;  %v637_v31 = vshll.u32 %v1524_v19, 16  ;;  %v1555_v13 = vld [vmem:[%s1949_s1] sm:$0xff]  }
  0x30   : > { %v1525_v32 = vld [vmem:[%s1704_s28 + $0xc8] sm:$0x1f]   ;;  %205 = vst.msk [vmem:[#allocation2 + $0x10] sm:$0xf0] %vm184_vm1, %v1547_v25  ;;  %v601_v33 = vor.u32 %v600_v21, %v596_v20  ;;  %v1526_v34 = vld [vmem:[%s1704_s28 + $0xc0] sm:$0x1f]   ;;  %v696_v36 = vor.u32 %v695_v24, %v692_v23  ;;  %v677_v43 = vor.u32 %v676_v26, %v672_v22  ;;  %1416 = vmatprep.subr.bf16.mxu0 %v1555_v13 }
  0x31   : > { %185 = vst.msk [vmem:[#allocation2] sm:$0xf0] %vm184_vm1, %v1548_v28  ;;  %v1551_v35 = vld [vmem:[%s1704_s28 + $0x18] ss:$0 sps:$4 sm:$0xff]   ;;  %v635_v37 = vshrl.u32 %v1524_v19, 16  ;;  %v655_v39 = vrot.slane %v653_v27, 4  ;;  %1417 = vmatpush3.bf16.msra.mxu0 %v1555_v13  ;;  %1430 = vmatprep.subr.bf16.mxu1 %v1555_v13 }
  0x32   : > { %362 = vrot.lane.b32.xlu1 %v361_v44, %s1623_s30  ;;  %v1236_v38 = vld [vmem:[%s1704_s28 + $0x10] sm:$0xf]  ;;  %v658_v40 = vrot.slane %v656_v30, 5  ;;  %v727_v41 = vshrl.u32 %v1525_v32, 16  ;;  %v730_v42 = vshll.u32 %v1525_v32, 16  ;;  %v639_v44 = vrot.slane %v637_v31, 1  ;;  %1433 = vmatpush3.bf16.msra.mxu1 %v1555_v13 }
  0x33   : > { %343 = vrot.lane.b32.xlu0 %v342_v47, %s1623_s30  ;;  %195 = vst.msk [vmem:[#allocation2 + $0x8] sm:$0xf0] %vm184_vm1, %v1551_v35  ;;  %v711_v45 = vshll.u32 %v1526_v34, 16  ;;  %v1554_v46 = vld [vmem:[%s1704_s28 + $0x38] ss:$0 sps:$4 sm:$0xff]   ;;  %v1556_v25 = vld [vmem:[%s1949_s1 + $0x8] sm:$0xff]  }
  0x34   : > { %188 = vst.msk [vmem:[#allocation2 + $0x8] sm:$0xf] %vm176_vm0, %v1236_v38  ;;  %v1242_v47 = vld [vmem:[%s1704_s28 + $0x30] sm:$0xf]  ;;  %v659_v48 = vor.u32 %v658_v40, %v655_v39  ;;  %v729_v49 = vrot.slane %v727_v41, 4  ;;  %1418 = vmatprep.subr.bf16.mxu0 %v1556_v25  ;;  %1431 = vmatprep.subr.bf16.mxu1 %v1556_v25 }
  0x35   : > { %208 = vst.msk [vmem:[#allocation2 + $0x18] sm:$0xf] %vm176_vm0, %v1242_v47  ;;  %v1534_v63 = vld [vmem:[%s1704_s28 + $0x38] ss:$0 sps:$4 sm:$0xff]   ;;  %v1536_v1 = vld [vmem:[%s1704_s28 + $0x50] ss:$0 sps:$4 sm:$0xff]   ;;  %1419 = vmatpush3.bf16.msra.mxu0 %v1556_v25 }
  0x36   : > { %436 = vrot.lane.b32.xlu1 %v435_v50, %s1623_s30  ;;  %v732_v50 = vrot.slane %v730_v42, 5  ;;  %215 = vst.msk [vmem:[#allocation2 + $0x18] sm:$0xf0] %vm184_vm1, %v1554_v46  ;;  %v1543_v3 = vld [vmem:[%s1704_s28 + $0x10] sm:$0x1f]   ;;  %1434 = vmatpush3.bf16.msra.mxu1 %v1556_v25  ;;  %vm812_vm0 = vcmask 257248  }
  0x37   : > { %417 = vrot.lane.b32.xlu0 %v416_v51, %s1623_s30  ;;  %v640_v51 = vor.u32 %v639_v44, %v635_v37  ;;  %v1544_v5 = vld [vmem:[%s1704_s28 + $0x8] sm:$0x1f]   ;;  %v1545_v6 = vld [vmem:[%s1704_s28 + $0x30] sm:$0x1f]   ;;  %v899_v8 = vshrl.u32 %v1543_v3, 16  ;;  %v902_v9 = vshll.u32 %v1543_v3, 16 }
  0x38   : > { %v1539_v7 = vld [vmem:[%s1704_s28 + $0x68] ss:$0 sps:$4 sm:$0xff]   ;;  %v1540_v10 = vld [vmem:[%s1704_s28 + $0x60] ss:$0 sps:$4 sm:$0xff]   ;;  %v977_v15 = vshll.u32 %v1545_v6, 16  ;;  %v880_v21 = vshrl.u32 %v1544_v5, 16 }
  0x39   : > { %v1546_v12 = vld [vmem:[%s1704_s28 + $0x28] sm:$0x1f]   ;;  %v1549_v16 = vld [vmem:[%s1704_s28 + $0x20] sm:$0x1f]   ;;  %v901_v19 = vrot.slane %v899_v8, 4  ;;  %v904_v20 = vrot.slane %v902_v9, 5 }
  0x3a   : > { %455 = vrot.lane.b32.xlu1 %v1503_v52, %s1624_s4  ;;  %v709_v52 = vshrl.u32 %v1526_v34, 16  ;;  %v1541_v17 = vld [vmem:[%s1704_s28 + $0x88] ss:$0 sps:$4 sm:$0xff]   ;;  %v1542_v18 = vld [vmem:[%s1704_s28 + $0x80] ss:$0 sps:$4 sm:$0xff]   ;;  %v958_v23 = vshll.u32 %v1546_v12, 16 }
  0x3b   : > { %445 = vrot.lane.b32.xlu0 %v1504_v53, %s1624_s4  ;;  %v713_v53 = vrot.slane %v711_v45, 1  ;;  %v1550_v24 = vld [vmem:[%s1704_s28 + $0x18] sm:$0x1f]   ;;  %v979_v27 = vrot.slane %v977_v15, 5  ;;  %v937_v28 = vshrl.u32 %v1549_v16, 16  ;;  %v940_v30 = vshll.u32 %v1549_v16, 16 }
  0x3c   : > { %v1552_v31 = vld [vmem:[%s1704_s28 + $0x40] sm:$0x1f]   ;;  %v960_v34 = vrot.slane %v958_v23, 1  ;;  %v921_v35 = vshll.u32 %v1550_v24, 16  ;;  %v919_v45 = vshrl.u32 %v1550_v24, 16  ;;  %vm909_vm1 = vcmask 294148  }
  0x3d   : > { %v1557_v37 = vld [vmem:[%s1949_s1 + $0x10] ss:$0 sps:$4 sm:$0x33]   ;;  %v939_v39 = vrot.slane %v937_v28, 4  ;;  %v942_v40 = vrot.slane %v940_v30, 5  ;;  %v1011_v41 = vshrl.u32 %v1552_v31, 16 }
  0x3e   : > { %492 = vrot.lane.b32.xlu1 %v1505_v54, %s1624_s4  ;;  %v733_v54 = vor.u32 %v732_v50, %v729_v49  ;;  %v1014_v42 = vshll.u32 %v1552_v31, 16  ;;  %1436 = vmatprep.subr.msk.bf16.mxu0 %vm1066_vm3, %v1557_v37  ;;  %v923_v46 = vrot.slane %v921_v35, 1 }
  0x3f   : > { %483 = vrot.lane.b32.xlu0 %v1506_v55, %s1624_s4  ;;  %v714_v55 = vor.u32 %v713_v53, %v709_v52  ;;  %1437 = vmatprep.subr.msk.bf16.mxu1 %vm1066_vm3, %v1557_v37  ;;  %v943_v50 = vor.u32 %v942_v40, %v939_v39 }
  0x40   : > { %v1016_v52 = vrot.slane %v1014_v42, 5  ;;  %v924_v53 = vor.u32 %v923_v46, %v919_v45 }
  0x42   : > { %474 = vrot.lane.b32.xlu1 %v1507_v56, %s1624_s4  ;;  %v1527_v56 = vld [vmem:[%s1704_s28 + $0x10] ss:$0 sps:$4 sm:$0xff]  }
  0x43   : > { %465 = vrot.lane.b32.xlu0 %v1508_v57, %s1624_s4  ;;  %v1528_v57 = vld [vmem:[%s1704_s28 + $0x8] ss:$0 sps:$4 sm:$0xff]  }
  0x46   : > { %510 = vrot.lane.b32.xlu1 %v1509_v58, %s1624_s4  ;;  %v1529_v58 = vld [vmem:[%s1704_s28 + $0x30] ss:$0 sps:$4 sm:$0xff]  }
  0x47   : > { %501 = vrot.lane.b32.xlu0 %v1510_v59, %s1624_s4  ;;  %v1530_v59 = vld [vmem:[%s1704_s28 + $0x28] ss:$0 sps:$4 sm:$0xff]   ;;  %s1408_s4 = sshll.u32 %s1673_s16, 10  ;;  %s1906_s16 = scalar_lea.sflag [#allocation4], %s164_s25 }
  0x4a   : > { %529 = vrot.lane.b32.xlu1 %v1511_v60, %s1625_s5  ;;  %v1531_v60 = vld [vmem:[%s1704_s28 + $0x20] ss:$0 sps:$4 sm:$0xff]  }
  0x4b   : > { %519 = vrot.lane.b32.xlu0 %v1512_v61, %s1625_s5  ;;  %v1532_v61 = vld [vmem:[%s1704_s28 + $0x18] ss:$0 sps:$4 sm:$0xff]  }
  0x4e   : > { %566 = vrot.lane.b32.xlu1 %v1513_v62, %s1625_s5  ;;  %v1533_v62 = vld [vmem:[%s1704_s28 + $0x40] ss:$0 sps:$4 sm:$0xff]  }
  0x4f   : > { %557 = vrot.lane.b32.xlu0 %v1514_v0, %s1625_s5  ;;  %v1535_v0 = vld [vmem:[%s1704_s28 + $0x58] ss:$0 sps:$4 sm:$0xff]  }
  0x52   : > { %548 = vrot.lane.b32.xlu1 %v1515_v2, %s1625_s5  ;;  %v1537_v2 = vld [vmem:[%s1704_s28 + $0x78] ss:$0 sps:$4 sm:$0xff]  }
  0x53   : > { %539 = vrot.lane.b32.xlu0 %v1516_v4, %s1625_s5  ;;  %v1538_v4 = vld [vmem:[%s1704_s28 + $0x70] ss:$0 sps:$4 sm:$0xff]  }
  0x56   : > { %584 = vrot.lane.b32.xlu1 %v1517_v11, %s1625_s5  ;;  %v882_v11 = vshll.u32 %v1544_v5, 16 }
  0x57   : > { %575 = vrot.lane.b32.xlu0 %v1518_v14, %s1625_s5  ;;  %v974_v14 = vshrl.u32 %v1545_v6, 16 }
  0x58   : > { %v884_v22 = vrot.slane %v882_v11, 1 }
  0x59   : > { %v976_v26 = vrot.slane %v974_v14, 4 }
  0x5a   : > { %622 = vrot.lane.b32.xlu1 %v621_v29, %s1626_s6  ;;  %v905_v29 = vor.u32 %v904_v20, %v901_v19  ;;  %v885_v32 = vor.u32 %v884_v22, %v880_v21 }
  0x5b   : > { %602 = vrot.lane.b32.xlu0 %v601_v33, %s1626_s6  ;;  %v956_v33 = vshrl.u32 %v1546_v12, 16  ;;  %v980_v38 = vor.u32 %v979_v27, %v976_v26 }
  0x5d   : > { %v961_v44 = vor.u32 %v960_v34, %v956_v33 }
  0x5e   : > { %697 = vrot.lane.b32.xlu1 %v696_v36, %s1626_s6  ;;  %v1553_v36 = vld [vmem:[%s1704_s28 + $0x38] sm:$0x1f]   ;;  %s1231_s28 = sshll.u32 %s164_s25, 6 }
  0x5f   : > { %678 = vrot.lane.b32.xlu0 %v677_v43, %s1626_s6  ;;  %v1068_v43 = vsel %vm1066_vm3, %v1557_v37, 0  ;;  %v995_v47 = vshll.u32 %v1553_v36, 16  ;;  %vm1053_vm3 = vcmask 293888   ;;  %s166_s29 = scalar_lea.vmem [#allocation3], %s1231_s28 }
  0x60   : > { %1421 = vmatpush3.bf16.msra.mxu0 %v1068_v43  ;;  %1435 = vmatpush3.bf16.msra.mxu1 %v1068_v43  ;;  %s1165_s5 = sshll.u32 %s166_s29, 4  ;;  %s1902_s5 = int_to_ptr.vmem [resolvable:$true] %s1165_s5 }
  0x61   : > { %s1558_s9 = scalar_lea.vmem %s1902_s5, 1024  ;;  %p1565_p0 = scmp.lt.s32.totalorder %s1902_s5, %s1563_s11 }
  0x62   : > { %660 = vrot.lane.b32.xlu1 %v659_v48, %s1626_s6  ;;  %p1559_p11 = scmp.ne.s32.totalorder %s1902_s5, %s1558_s9  ;;  %p1566_p1 = scmp.lt.s32.totalorder %s1564_s17, %s1558_s9 }
  0x63   : > { %641 = vrot.lane.b32.xlu0 %v640_v51, %s1626_s6  ;;  %v1013_v51 = vrot.slane %v1011_v41, 4 }
  0x64   : > { %p1560_p12 = pnand %p1559_p11, %p1690_p5  ;;  %p1567_p2 = por %p1566_p1, %p1565_p0 }
  0x66   : > { %734 = vrot.lane.b32.xlu1 %v733_v54, %s1626_s6  ;;  %v993_v54 = vshrl.u32 %v1553_v36, 16  ;;  %p1561_p13 = pneg %p1560_p12 }
  0x67   : > { %715 = vrot.lane.b32.xlu0 %v714_v55, %s1626_s6  ;;  %v997_v55 = vrot.slane %v995_v47, 1 }
  0x68   : > { %p1568_p3 = pnand %p1567_p2, %p1561_p13 }
  0x6a   : > { %751 = vrot.lane.b32.xlu1 %v1527_v56, %s1627_s7 }
  0x6b   : > { %742 = vrot.lane.b32.xlu0 %v1528_v57, %s1627_s7 }
  0x6e   : > { %784 = vrot.lane.b32.xlu1 %v1529_v58, %s1627_s7  ;;  %v1017_v58 = vor.u32 %v1016_v52, %v1013_v51 }
  0x6f   : > { %776 = vrot.lane.b32.xlu0 %v1530_v59, %s1627_s7  ;;  %v998_v59 = vor.u32 %v997_v55, %v993_v54 }
  0x72   : > { %768 = vrot.lane.b32.xlu1 %v1531_v60, %s1627_s7 }
  0x73   : > { %760 = vrot.lane.b32.xlu0 %v1532_v61, %s1627_s7 }
  0x76   : > { %801 = vrot.lane.b32.xlu1 %v1533_v62, %s1627_s7 }
  0x77   : > { %792 = vrot.lane.b32.xlu0 %v1534_v63, %s1627_s7 }
  0x7a   : > { %818 = vrot.lane.b32.xlu1 %v1535_v0, %s1628_s8 }
  0x7b   : > { %809 = vrot.lane.b32.xlu0 %v1536_v1, %s1628_s8 }
  0x7e   : > { %851 = vrot.lane.b32.xlu1 %v1537_v2, %s1628_s8 }
  0x7f   : > { %843 = vrot.lane.b32.xlu0 %v1538_v4, %s1628_s8 }
  0x82   : > { %835 = vrot.lane.b32.xlu1 %v1539_v7, %s1628_s8 }
  0x83   : > { %827 = vrot.lane.b32.xlu0 %v1540_v10, %s1628_s8 }
  0x86   : > { %868 = vrot.lane.b32.xlu1 %v1541_v17, %s1628_s8 }
  0x87   : > { %859 = vrot.lane.b32.xlu0 %v1542_v18, %s1628_s8  ;;  %s1900_s8 = scalar_lea.hbm %s1951_s3, %s1408_s4 }
  0x8a   : > { %906 = vrot.lane.b32.xlu1 %v905_v29, %s1629_s24 }
  0x8b   : > { %886 = vrot.lane.b32.xlu0 %v885_v32, %s1629_s24 }
  0x8c   : > { %v260_v48 = vpop.permute.xlu1 %259 }
  0x8d   : > { %262 = vst.msk [vmem:[#allocation2 + $0x10] sm:$0xf] %vm224_vm2, %v260_v48  ;;  %v222_v49 = vpop.permute.xlu0 %221 }
  0x8e   : > { %225 = vst.msk [vmem:[#allocation2] sm:$0xf] %vm224_vm2, %v222_v49  ;;  %981 = vrot.lane.b32.xlu1 %v980_v38, %s1629_s24 }
  0x8f   : > { %962 = vrot.lane.b32.xlu0 %v961_v44, %s1629_s24 }
  0x90   : > { %v269_v56 = vpop.permute.xlu1 %268 }
  0x91   : > { %271 = vst.msk [vmem:[#allocation2 + $0x10] sm:$0xf0] %vm234_vm4, %v269_v56  ;;  %v232_v57 = vpop.permute.xlu0 %231 }
  0x92   : > { %235 = vst.msk [vmem:[#allocation2] sm:$0xf0] %vm234_vm4, %v232_v57  ;;  %944 = vrot.lane.b32.xlu1 %v943_v50, %s1629_s24 }
  0x93   : > { %925 = vrot.lane.b32.xlu0 %v924_v53, %s1629_s24 }
  0x94   : > { %v251_v60 = vpop.permute.xlu1 %250 }
  0x95   : > { %253 = vst.msk [vmem:[#allocation2 + $0x8] sm:$0xf0] %vm234_vm4, %v251_v60  ;;  %v242_v61 = vpop.permute.xlu0 %241  ;;  %v1395_v60 = vld [vmem:[%s1950_s2] ss:$0 sm:$0xff] }
  0x96   : > { %244 = vst.msk [vmem:[#allocation2 + $0x8] sm:$0xf] %vm224_vm2, %v242_v61  ;;  %1018 = vrot.lane.b32.xlu1 %v1017_v58, %s1629_s24 }
  0x97   : > { %999 = vrot.lane.b32.xlu0 %v998_v59, %s1629_s24 }
  0x98   : > { %v287_v62 = vpop.permute.xlu1 %286 }
  0x99   : > { %289 = vst.msk [vmem:[#allocation2 + $0x18] sm:$0xf0] %vm234_vm4, %v287_v62  ;;  %v278_v63 = vpop.permute.xlu0 %277 }
  0x9a   : > { %280 = vst.msk [vmem:[#allocation2 + $0x18] sm:$0xf] %vm224_vm2, %v278_v63  ;;  %vm889_vm2 = vcmask 290048  }
  0x9c   : > { %v325_v0 = vpop.permute.xlu1 %324 }
  0x9d   : > { %328 = vst.msk [vmem:[#allocation2] sm:$0xf0] %vm327_vm5, %v325_v0  ;;  %v305_v1 = vpop.permute.xlu0 %304 }
  0x9e   : > { %308 = vst.msk [vmem:[#allocation2] sm:$0xf] %vm307_vm6, %v305_v1 }
  0xa0   : > { %v400_v2 = vpop.permute.xlu1 %399 }
  0xa1   : > { %402 = vst.msk [vmem:[#allocation2 + $0x10] sm:$0xf0] %vm327_vm5, %v400_v2  ;;  %v381_v3 = vpop.permute.xlu0 %380 }
  0xa2   : > { %383 = vst.msk [vmem:[#allocation2 + $0x10] sm:$0xf] %vm307_vm6, %v381_v3 }
  0xa4   : > { %v363_v4 = vpop.permute.xlu1 %362 }
  0xa5   : > { %365 = vst.msk [vmem:[#allocation2 + $0x8] sm:$0xf0] %vm327_vm5, %v363_v4  ;;  %v344_v5 = vpop.permute.xlu0 %343 }
  0xa6   : > { %346 = vst.msk [vmem:[#allocation2 + $0x8] sm:$0xf] %vm307_vm6, %v344_v5 }
  0xa8   : > { %v437_v6 = vpop.permute.xlu1 %436 }
  0xa9   : > { %439 = vst.msk [vmem:[#allocation2 + $0x18] sm:$0xf0] %vm327_vm5, %v437_v6  ;;  %v418_v7 = vpop.permute.xlu0 %417 }
  0xaa   : > { %420 = vst.msk [vmem:[#allocation2 + $0x18] sm:$0xf] %vm307_vm6, %v418_v7 }
  0xac   : > { %v456_v8 = vpop.permute.xlu1 %455 }
  0xad   : > { %459 = vst.msk [vmem:[#allocation2] sm:$0xf0] %vm458_vm7, %v456_v8  ;;  %v446_v9 = vpop.permute.xlu0 %445 }
  0xae   : > { %449 = vst.msk [vmem:[#allocation2] sm:$0xf] %vm448_vm8, %v446_v9 }
  0xb0   : > { %v493_v10 = vpop.permute.xlu1 %492 }
  0xb1   : > { %495 = vst.msk [vmem:[#allocation2 + $0x10] sm:$0xf0] %vm458_vm7, %v493_v10  ;;  %v484_v11 = vpop.permute.xlu0 %483 }
  0xb2   : > { %486 = vst.msk [vmem:[#allocation2 + $0x10] sm:$0xf] %vm448_vm8, %v484_v11 }
  0xb4   : > { %v475_v12 = vpop.permute.xlu1 %474 }
  0xb5   : > { %477 = vst.msk [vmem:[#allocation2 + $0x8] sm:$0xf0] %vm458_vm7, %v475_v12  ;;  %v466_v13 = vpop.permute.xlu0 %465 }
  0xb6   : > { %468 = vst.msk [vmem:[#allocation2 + $0x8] sm:$0xf] %vm448_vm8, %v466_v13 }
  0xb8   : > { %v511_v14 = vpop.permute.xlu1 %510 }
  0xb9   : > { %513 = vst.msk [vmem:[#allocation2 + $0x18] sm:$0xf0] %vm458_vm7, %v511_v14  ;;  %v502_v15 = vpop.permute.xlu0 %501 }
  0xba   : > { %504 = vst.msk [vmem:[#allocation2 + $0x18] sm:$0xf] %vm448_vm8, %v502_v15 }
  0xbc   : > { %v530_v16 = vpop.permute.xlu1 %529 }
  0xbd   : > { %533 = vst.msk [vmem:[#allocation2] sm:$0xf0] %vm532_vm9, %v530_v16  ;;  %v520_v17 = vpop.permute.xlu0 %519 }
  0xbe   : > { %523 = vst.msk [vmem:[#allocation2] sm:$0xf] %vm522_vm10, %v520_v17 }
  0xc0   : > { %v567_v18 = vpop.permute.xlu1 %566 }
  0xc1   : > { %569 = vst.msk [vmem:[#allocation2 + $0x10] sm:$0xf0] %vm532_vm9, %v567_v18  ;;  %v558_v19 = vpop.permute.xlu0 %557 }
  0xc2   : > { %560 = vst.msk [vmem:[#allocation2 + $0x10] sm:$0xf] %vm522_vm10, %v558_v19 }
  0xc4   : > { %v549_v20 = vpop.permute.xlu1 %548 }
  0xc5   : > { %551 = vst.msk [vmem:[#allocation2 + $0x8] sm:$0xf0] %vm532_vm9, %v549_v20  ;;  %v540_v21 = vpop.permute.xlu0 %539 }
  0xc6   : > { %542 = vst.msk [vmem:[#allocation2 + $0x8] sm:$0xf] %vm522_vm10, %v540_v21 }
  0xc8   : > { %v585_v22 = vpop.permute.xlu1 %584 }
  0xc9   : > { %587 = vst.msk [vmem:[#allocation2 + $0x18] sm:$0xf0] %vm532_vm9, %v585_v22  ;;  %v576_v23 = vpop.permute.xlu0 %575 }
  0xca   : > { %578 = vst.msk [vmem:[#allocation2 + $0x18] sm:$0xf] %vm522_vm10, %v576_v23 }
  0xcc   : > { %v623_v24 = vpop.permute.xlu1 %622 }
  0xcd   : > { %626 = vst.msk [vmem:[#allocation2] sm:$0xf0] %vm625_vm11, %v623_v24  ;;  %v603_v25 = vpop.permute.xlu0 %602 }
  0xce   : > { %606 = vst.msk [vmem:[#allocation2] sm:$0xf] %vm605_vm12, %v603_v25 }
  0xd0   : > { %v698_v26 = vpop.permute.xlu1 %697 }
  0xd1   : > { %700 = vst.msk [vmem:[#allocation2 + $0x10] sm:$0xf0] %vm625_vm11, %v698_v26  ;;  %v679_v27 = vpop.permute.xlu0 %678 }
  0xd2   : > { %681 = vst.msk [vmem:[#allocation2 + $0x10] sm:$0xf] %vm605_vm12, %v679_v27 }
  0xd4   : > { %v661_v28 = vpop.permute.xlu1 %660 }
  0xd5   : > { %663 = vst.msk [vmem:[#allocation2 + $0x8] sm:$0xf0] %vm625_vm11, %v661_v28  ;;  %v642_v29 = vpop.permute.xlu0 %641 }
  0xd6   : > { %644 = vst.msk [vmem:[#allocation2 + $0x8] sm:$0xf] %vm605_vm12, %v642_v29 }
  0xd8   : > { %v735_v30 = vpop.permute.xlu1 %734 }
  0xd9   : > { %737 = vst.msk [vmem:[#allocation2 + $0x18] sm:$0xf0] %vm625_vm11, %v735_v30  ;;  %v716_v31 = vpop.permute.xlu0 %715 }
  0xda   : > { %718 = vst.msk [vmem:[#allocation2 + $0x18] sm:$0xf] %vm605_vm12, %v716_v31 }
  0xdc   : > { %v752_v32 = vpop.permute.xlu1 %751 }
  0xdd   : > { %755 = vst.msk [vmem:[#allocation2] sm:$0xf0] %vm754_vm13, %v752_v32  ;;  %v743_v33 = vpop.permute.xlu0 %742 }
  0xde   : > { %746 = vst.msk [vmem:[#allocation2] sm:$0xf] %vm745_vm14, %v743_v33 }
  0xe0   : > { %v785_v34 = vpop.permute.xlu1 %784 }
  0xe1   : > { %787 = vst.msk [vmem:[#allocation2 + $0x10] sm:$0xf0] %vm754_vm13, %v785_v34  ;;  %v777_v35 = vpop.permute.xlu0 %776 }
  0xe2   : > { %779 = vst.msk [vmem:[#allocation2 + $0x10] sm:$0xf] %vm745_vm14, %v777_v35 }
  0xe4   : > { %v769_v36 = vpop.permute.xlu1 %768 }
  0xe5   : > { %771 = vst.msk [vmem:[#allocation2 + $0x8] sm:$0xf0] %vm754_vm13, %v769_v36  ;;  %v761_v37 = vpop.permute.xlu0 %760 }
  0xe6   : > { %763 = vst.msk [vmem:[#allocation2 + $0x8] sm:$0xf] %vm745_vm14, %v761_v37 }
  0xe8   : > { %v802_v38 = vpop.permute.xlu1 %801 }
  0xe9   : > { %804 = vst.msk [vmem:[#allocation2 + $0x18] sm:$0xf0] %vm754_vm13, %v802_v38  ;;  %v793_v39 = vpop.permute.xlu0 %792 }
  0xea   : > { %795 = vst.msk [vmem:[#allocation2 + $0x18] sm:$0xf] %vm745_vm14, %v793_v39 }
  0xec   : > { %v819_v40 = vpop.permute.xlu1 %818 }
  0xed   : > { %822 = vst.msk [vmem:[#allocation2] sm:$0xf0] %vm821_vm15, %v819_v40  ;;  %v810_v41 = vpop.permute.xlu0 %809 }
  0xee   : > { %813 = vst.msk [vmem:[#allocation2] sm:$0xf] %vm812_vm0, %v810_v41 }
  0xf0   : > { %v852_v42 = vpop.permute.xlu1 %851 }
  0xf1   : > { %854 = vst.msk [vmem:[#allocation2 + $0x10] sm:$0xf0] %vm821_vm15, %v852_v42  ;;  %v844_v43 = vpop.permute.xlu0 %843 }
  0xf2   : > { %846 = vst.msk [vmem:[#allocation2 + $0x10] sm:$0xf] %vm812_vm0, %v844_v43 }
  0xf4   : > { %v836_v44 = vpop.permute.xlu1 %835 }
  0xf5   : > { %838 = vst.msk [vmem:[#allocation2 + $0x8] sm:$0xf0] %vm821_vm15, %v836_v44  ;;  %v828_v45 = vpop.permute.xlu0 %827 }
  0xf6   : > { %830 = vst.msk [vmem:[#allocation2 + $0x8] sm:$0xf] %vm812_vm0, %v828_v45 }
  0xf8   : > { %v869_v46 = vpop.permute.xlu1 %868 }
  0xf9   : > { %871 = vst.msk [vmem:[#allocation2 + $0x18] sm:$0xf0] %vm821_vm15, %v869_v46  ;;  %v860_v47 = vpop.permute.xlu0 %859 }
  0xfa   : > { %862 = vst.msk [vmem:[#allocation2 + $0x18] sm:$0xf] %vm812_vm0, %v860_v47 }
  0xfc   : > { %v907_v48 = vpop.permute.xlu1 %906 }
  0xfd   : > { %910 = vst.msk [vmem:[#allocation2] sm:$0xf0] %vm909_vm1, %v907_v48  ;;  %v887_v49 = vpop.permute.xlu0 %886 }
  0xfe   : > { %890 = vst.msk [vmem:[#allocation2] sm:$0xf] %vm889_vm2, %v887_v49 }
 0x100   : > { %v982_v50 = vpop.permute.xlu1 %981 }
 0x101   : > { %984 = vst.msk [vmem:[#allocation2 + $0x10] sm:$0xf0] %vm909_vm1, %v982_v50  ;;  %v963_v51 = vpop.permute.xlu0 %962 }
 0x102   : > { %965 = vst.msk [vmem:[#allocation2 + $0x10] sm:$0xf] %vm889_vm2, %v963_v51 }
 0x104   : > { %v945_v52 = vpop.permute.xlu1 %944 }
 0x105   : > { %947 = vst.msk [vmem:[#allocation2 + $0x8] sm:$0xf0] %vm909_vm1, %v945_v52  ;;  %v926_v53 = vpop.permute.xlu0 %925  ;;  %v1028_v54 = vld [vmem:[#allocation2] sm:$0xff] }
 0x106   : > { %928 = vst.msk [vmem:[#allocation2 + $0x8] sm:$0xf] %vm889_vm2, %v926_v53  ;;  %1422 = vmatprep.mubr.msk.bf16.mxu0 %vm1053_vm3, %v1028_v54 }
 0x108   : > { %v1019_v55 = vpop.permute.xlu1 %1018 }
 0x109   : > { %1021 = vst.msk [vmem:[#allocation2 + $0x18] sm:$0xf0] %vm909_vm1, %v1019_v55  ;;  %v1000_v56 = vpop.permute.xlu0 %999  ;;  %v1030_v57 = vld [vmem:[#allocation2 + $0x10] sm:$0xff] }
 0x10a   : > { %1002 = vst.msk [vmem:[#allocation2 + $0x18] sm:$0xf] %vm889_vm2, %v1000_v56  ;;  %1426 = vmatprep.mubr.msk.bf16.mxu1 %vm1053_vm3, %v1030_v57 }
 0x10d   : > { %v1029_v58 = vld [vmem:[#allocation2 + $0x8] sm:$0xff] }
 0x10e   : > { %1423 = vmatmul.mubr.msk.bf16.vlgmr.msra.gmra.mrb[0].mxu0 %vm1053_vm3, %v1029_v58 }
 0x111   : > { %v1031_v59 = vld [vmem:[#allocation2 + $0x18] sm:$0xff] }
 0x112   : > { %1427 = vmatmul.mubr.msk.bf16.vlgmr.msra.gmra.mrb[0].mxu1 %vm1053_vm3, %v1031_v59 }
 0x1e1   : > { %v1424_v61 = vpop.f32.mrb[0].mxu0 }
 0x1e2   : > { %v1113_v62 = vadd.f32 %v1424_v61, %v1395_v60  ;;  %v1104_v63 = vpop.f32.mrb[1].mxu0 }
 0x1e3   : > { %v1105_v0 = vadd.f32 %v1395_v60, %v1104_v63  ;;  %v1425_v1 = vpop.f32.mrb[2].mxu0 }
 0x1e4   : > { %v1137_v2 = vmax.f32 %v1113_v62, 0.0  ;;  %v1116_v3 = vadd.f32 %v1425_v1, %v1395_v60  ;;  %v1107_v4 = vpop.f32.mrb[3].mxu0 }
 0x1e5   : > { %v1135_v5 = vmax.f32 %v1105_v0, 0.0  ;;  %v1108_v6 = vadd.f32 %v1395_v60, %v1107_v4  ;;  %v1428_v7 = vpop.f32.mrb[0].mxu1 }
 0x1e6   : > { %1145 = vst [vmem:[%s166_s29 + $0x10] sm:$0xff] %v1137_v2  ;;  %v1138_v8 = vmax.f32 %v1116_v3, 0.0  ;;  %v1129_v9 = vadd.f32 %v1428_v7, %v1395_v60  ;;  %v1120_v10 = vpop.f32.mrb[1].mxu1 }
 0x1e7   : > { %1143 = vst [vmem:[%s166_s29] sm:$0xff] %v1135_v5  ;;  %v1136_v11 = vmax.f32 %v1108_v6, 0.0  ;;  %v1121_v12 = vadd.f32 %v1395_v60, %v1120_v10  ;;  %v1429_v13 = vpop.f32.mrb[2].mxu1 }
 0x1e8   : > { %1146 = vst [vmem:[%s166_s29 + $0x18] sm:$0xff] %v1138_v8  ;;  %v1141_v14 = vmax.f32 %v1129_v9, 0.0  ;;  %v1132_v15 = vadd.f32 %v1429_v13, %v1395_v60  ;;  %v1123_v16 = vpop.f32.mrb[3].mxu1 }
 0x1e9   : > { %1144 = vst [vmem:[%s166_s29 + $0x8] sm:$0xff] %v1136_v11  ;;  %v1139_v17 = vmax.f32 %v1121_v12, 0.0  ;;  %v1124_v18 = vadd.f32 %v1395_v60, %v1123_v16 }
 0x1ea   : > { %1149 = vst [vmem:[%s166_s29 + $0x30] sm:$0xff] %v1141_v14  ;;  %v1142_v19 = vmax.f32 %v1132_v15, 0.0 }
 0x1eb   : > { %1147 = vst [vmem:[%s166_s29 + $0x20] sm:$0xff] %v1139_v17  ;;  %v1140_v20 = vmax.f32 %v1124_v18, 0.0 }
 0x1ec   : > { %1150 = vst [vmem:[%s166_s29 + $0x38] sm:$0xff] %v1142_v19 }
 0x1ed   : > { %1148 = vst [vmem:[%s166_s29 + $0x28] sm:$0xff] %v1140_v20 }
 0x1ee   : > { %1571 = shalt.err (!%p1568_p3)
}
 0x1ef   : > { %s1572_s19 = scalar_lea.hbm %s1900_s8, 1024  ;;  %s1576_s25 = scalar_lea.hbm %s1951_s3, 2048 }
 0x1f0   : > { %p1573_p4 = scmp.ne.s32.totalorder %s1900_s8, %s1572_s19  ;;  %p1577_p9 = scmp.lt.u32.totalorder %s1900_s8, %s1951_s3 }
 0x1f1   : > { %p1578_p10 = scmp.lt.u32.totalorder %s1576_s25, %s1572_s19  ;;  %p1580_p12 = scmp.lt.u32.totalorder %s1572_s19, %s1900_s8 }
 0x1f2   : > { %p1574_p7 = pnand %p1573_p4, %p1690_p5 }
 0x1f3   : > { %p1579_p11 = por %p1578_p10, %p1577_p9 }
 0x1f4   : > { %p1575_p8 = pneg %p1574_p7 }
 0x1f5   : > { %p1581_p13 = por %p1580_p12, %p1579_p11 }
 0x1f7   : > { %p1582_p0 = pnand %p1581_p13, %p1575_p8 }
 0x1f9   : > { %1585 = shalt.err (!%p1582_p0)
}
 0x1fa   : > { %s1631_s28 = smov 128  }
 0x1fb   : > { %1439 = dma.vmem_to_hbm [thread:$0]  (%p1690_p5), %s1902_s5, 1024, %s1900_s8, %s1906_s16, %s1631_s28, %s1631_s28, %s1623_s30  }
 0x1fc PF: > { %p1445_p1 = scmp.ge.s32.totalorder %s1620_s15, 2  ;;  %s1180_s29 = sand.u32 1, %s1608_s12  }
 0x1fd   : > { %s1181_s4 = scalar_lea.sflag [#allocation4], %s1180_s29 }
 0x1fe   : > { %p1442_p2 = pnand %p1445_p1, %p1694_p6 }
 0x200   : > { %1603 = dma.done.wait (!%p1442_p2), %s1181_s4, 1024  }
 0x201   : > { %1605 = vsyncadd (!%p1442_p2), %s1181_s4, 4294966272  ;;  %p13_p3 = scmp.ge.s32.totalorder %s1677_s18, 4   ;;  %s1954_s12 = smov %s1612_s13 }
 0x202   : > { %s1955_s13 = smov %s1616_s14  ;;  %s1956_s14 = smov %s1688_s21 }
 0x203   : > { %s1957_s15 = smov %s1677_s18  ;;  %15 = sbr.rel (!%p13_p3) target bundleno = 3 (0x3), region = 100 }
 0x20a   :  { %1186 = vsyncpa [#allocation4], 1 }
 0x20b   :  { %1188 = vsyncpa [#allocation4 + $0x1], 1 }

</bundles_post_ra>
